<compile_context>
chip_gen: v7x
topology: tpu7x:2x2x1
jax: 0.10.0
libtpu: 0.0.40
codegen_flags: <defaults>
</compile_context>

<pallas_src>
import jax
import jax.numpy as jnp
from jax.experimental import pallas as pl
from jax.experimental.pallas import tpu as pltpu


_SQRT_2_OVER_PI = 0.7978845608028654


def _gelu(x):
    # TODO(synk): PyTorch nn.GELU() defaults to the exact erf-based GELU; the
    # tanh approximation (max abs err ~3e-4) is used here because tanh is
    # guaranteed to lower to the TPU EUP under Mosaic.
    return 0.5 * x * (1.0 + jnp.tanh(_SQRT_2_OVER_PI * (x + 0.044715 * x * x * x)))


def mask_head_kernel(x_ref, attn_ref,
                     ln_g_ref, ln_b_ref,
                     w1_ref, b1_ref, w2_ref, b2_ref,
                     wa_ref, ba_ref,
                     wp_tok_ref, wp_att_ref, bp_ref,
                     o_ref):
    x = x_ref[...]                                               # [T, H] f32

    # LayerNorm(hidden_size, eps=1e-12)
    mean = jnp.mean(x, axis=-1, keepdims=True)
    d = x - mean
    var = jnp.mean(d * d, axis=-1, keepdims=True)
    xn = d * jax.lax.rsqrt(var + 1e-12)
    xn = xn * ln_g_ref[...] + ln_b_ref[...]

    # feature_transform: Linear(H,H) -> GELU -> [drop] -> Linear(H,H/2) -> GELU -> [drop]
    h1 = _gelu(jnp.dot(xn, w1_ref[...],
                       preferred_element_type=jnp.float32) + b1_ref[...])
    tok = _gelu(jnp.dot(h1, w2_ref[...],
                        preferred_element_type=jnp.float32) + b2_ref[...])      # [T, H/2]

    # attention branch: mean over heads, bmm with the *raw* hidden states
    avg_attn = jnp.mean(attn_ref[...], axis=0)                   # [T, T]
    af = jnp.dot(avg_attn, x, preferred_element_type=jnp.float32)                # [T, H]
    af = _gelu(jnp.dot(af, wa_ref[...],
                       preferred_element_type=jnp.float32) + ba_ref[...])       # [T, H/2]

    # combined_projection on cat([tok, af], -1) == tok @ Wp_top + af @ Wp_bot + bp
    logits = (jnp.dot(tok, wp_tok_ref[...], preferred_element_type=jnp.float32)
              + jnp.dot(af, wp_att_ref[...], preferred_element_type=jnp.float32)
              + bp_ref[...])
    o_ref[...] = logits


def mask_prediction_head_forward(hidden_states, attention_maps, params):
    B, T, H = hidden_states.shape
    nH = attention_maps.shape[1]
    Hh = H // 2
    C = params["bp"].shape[0]

    def full(shape):  # whole-array, VMEM-resident block (constant index_map)
        return pl.BlockSpec(shape, lambda b, _n=len(shape): (0,) * _n)

    grid_spec = pltpu.PrefetchScalarGridSpec(
        num_scalar_prefetch=0,
        grid=(B,),
        in_specs=[
            pl.BlockSpec((None, T, H), lambda b: (b, 0, 0)),         # hidden_states[b]
            pl.BlockSpec((None, nH, T, T), lambda b: (b, 0, 0, 0)),  # attention_maps[b]
            full((1, H)), full((1, H)),                              # LN gamma / beta
            full((H, H)), full((1, H)),                              # W1, b1
            full((H, Hh)), full((1, Hh)),                            # W2, b2
            full((H, Hh)), full((1, Hh)),                            # Wa, ba
            full((Hh, C)), full((Hh, C)), full((1, C)),              # Wp_tok, Wp_att, bp
        ],
        out_specs=pl.BlockSpec((None, T, C), lambda b: (b, 0, 0)),
    )

    return pl.pallas_call(
        mask_head_kernel,
        out_shape=jax.ShapeDtypeStruct((B, T, C), jnp.float32),
        grid_spec=grid_spec,
        compiler_params=pltpu.CompilerParams(dimension_semantics=("parallel",)),
    )(hidden_states, attention_maps,
      params["ln_gamma"].reshape(1, H), params["ln_beta"].reshape(1, H),
      params["w1_t"], params["b1"].reshape(1, H),
      params["w2_t"], params["b2"].reshape(1, Hh),
      params["wa_t"], params["ba"].reshape(1, Hh),
      params["wp_t"][:Hh], params["wp_t"][Hh:], params["bp"].reshape(1, C))


# --------------------------- deterministic init --------------------------------

def _trunc_normal(key, shape, std=0.02):
    # matches nn.init.trunc_normal_(std=0.02, a=-0.04, b=0.04) == +/- 2 sigma
    return std * jax.random.truncated_normal(key, -2.0, 2.0, shape, jnp.float32)


def init_params(key, hidden_size, num_classes):
    H, Hh = hidden_size, hidden_size // 2
    k1, k2, k3, k4 = jax.random.split(key, 4)
    return dict(
        ln_gamma=jnp.ones((H,), jnp.float32),
        ln_beta=jnp.zeros((H,), jnp.float32),
        # PyTorch Linear stores weight as [out, in]; stored transposed [in, out].
        w1_t=_trunc_normal(k1, (H, H)),
        b1=jnp.zeros((H,), jnp.float32),
        w2_t=_trunc_normal(k2, (H, Hh)),
        b2=jnp.zeros((Hh,), jnp.float32),
        wa_t=_trunc_normal(k3, (H, Hh)),
        ba=jnp.zeros((Hh,), jnp.float32),
        wp_t=_trunc_normal(k4, (H, num_classes)),
        bp=jnp.zeros((num_classes,), jnp.float32),
    )


# ----------------------------------- main --------------------------------------

if __name__ == "__main__":
    key = jax.random.PRNGKey(0)
    B, num_heads, H, C = 2, 4, 128, 16
    height = width = 8
    T = height * width                       # 64 tokens (8x8 spatial grid)

    k_h, k_a, k_p = jax.random.split(key, 3)
    hidden_states = jax.random.normal(k_h, (B, T, H), jnp.float32)
    attention_maps = jax.nn.softmax(
        jax.random.normal(k_a, (B, num_heads, T, T), jnp.float32), axis=-1)
    params = init_params(k_p, H, C)

    logits = mask_prediction_head_forward(hidden_states, attention_maps, params)
    jax.block_until_ready(logits)
    assert logits.shape == (B, T, C)
    assert bool(jnp.all(jnp.isfinite(logits)))
    print("KERNEL_OK")
</pallas_src>

<mosaic_0001>
module attributes {stable_mosaic.version = 11 : i64} {
  func.func @mask_head_kernel(%arg0: i32, %arg1: memref<1x64x128xf32, #tpu.memory_space<vmem>>, %arg2: memref<1x4x64x64xf32, #tpu.memory_space<vmem>>, %arg3: memref<1x128xf32, #tpu.memory_space<vmem>>, %arg4: memref<1x128xf32, #tpu.memory_space<vmem>>, %arg5: memref<128x128xf32, #tpu.memory_space<vmem>>, %arg6: memref<1x128xf32, #tpu.memory_space<vmem>>, %arg7: memref<128x64xf32, #tpu.memory_space<vmem>>, %arg8: memref<1x64xf32, #tpu.memory_space<vmem>>, %arg9: memref<128x64xf32, #tpu.memory_space<vmem>>, %arg10: memref<1x64xf32, #tpu.memory_space<vmem>>, %arg11: memref<64x16xf32, #tpu.memory_space<vmem>>, %arg12: memref<64x16xf32, #tpu.memory_space<vmem>>, %arg13: memref<1x16xf32, #tpu.memory_space<vmem>>, %arg14: memref<1x64x16xf32, #tpu.memory_space<vmem>>) attributes {dimension_semantics = [#tpu.dimension_semantics<parallel>], iteration_bounds = array<i64: 2>, scalar_prefetch = 0 : i64, scratch_operands = 0 : i64, tpu.core_type = #tpu.core_type<tc>, window_params = [{transform_indices = @transform_0, window_bounds = array<i64: 1, 64, 128>}, {transform_indices = @transform_1, window_bounds = array<i64: 1, 4, 64, 64>}, {pipeline_mode = #tpu.pipeline_mode<synchronous>, transform_indices = @transform_2, window_bounds = array<i64: 1, 128>}, {pipeline_mode = #tpu.pipeline_mode<synchronous>, transform_indices = @transform_3, window_bounds = array<i64: 1, 128>}, {pipeline_mode = #tpu.pipeline_mode<synchronous>, transform_indices = @transform_4, window_bounds = array<i64: 128, 128>}, {pipeline_mode = #tpu.pipeline_mode<synchronous>, transform_indices = @transform_5, window_bounds = array<i64: 1, 128>}, {pipeline_mode = #tpu.pipeline_mode<synchronous>, transform_indices = @transform_6, window_bounds = array<i64: 128, 64>}, {pipeline_mode = #tpu.pipeline_mode<synchronous>, transform_indices = @transform_7, window_bounds = array<i64: 1, 64>}, {pipeline_mode = #tpu.pipeline_mode<synchronous>, transform_indices = @transform_8, window_bounds = array<i64: 128, 64>}, {pipeline_mode = #tpu.pipeline_mode<synchronous>, transform_indices = @transform_9, window_bounds = array<i64: 1, 64>}, {pipeline_mode = #tpu.pipeline_mode<synchronous>, transform_indices = @transform_10, window_bounds = array<i64: 64, 16>}, {pipeline_mode = #tpu.pipeline_mode<synchronous>, transform_indices = @transform_11, window_bounds = array<i64: 64, 16>}, {pipeline_mode = #tpu.pipeline_mode<synchronous>, transform_indices = @transform_12, window_bounds = array<i64: 1, 16>}, {transform_indices = @transform_13, window_bounds = array<i64: 1, 64, 16>}]} {
    %c0 = arith.constant 0 : index
    %c0_0 = arith.constant 0 : index
    %c0_1 = arith.constant 0 : index
    %0 = vector.load %arg1[%c0, %c0_0, %c0_1] : memref<1x64x128xf32, #tpu.memory_space<vmem>>, vector<1x64x128xf32>
    %1 = vector.shape_cast %0 : vector<1x64x128xf32> to vector<64x128xf32>
    %cst = arith.constant dense<0.000000e+00> : vector<64xf32>
    %2 = vector.multi_reduction <add>, %1, %cst [1] : vector<64x128xf32> to vector<64xf32>
    %3 = vector.shape_cast %2 : vector<64xf32> to vector<64x1xf32>
    %cst_2 = arith.constant 1.280000e+02 : f32
    %4 = vector.broadcast %cst_2 : f32 to vector<64x1xf32>
    %5 = arith.divf %3, %4 : vector<64x1xf32>
    %6 = vector.broadcast %5 : vector<64x1xf32> to vector<64x128xf32>
    %7 = arith.subf %1, %6 : vector<64x128xf32>
    %8 = arith.mulf %7, %7 : vector<64x128xf32>
    %cst_3 = arith.constant dense<0.000000e+00> : vector<64xf32>
    %9 = vector.multi_reduction <add>, %8, %cst_3 [1] : vector<64x128xf32> to vector<64xf32>
    %10 = vector.shape_cast %9 : vector<64xf32> to vector<64x1xf32>
    %cst_4 = arith.constant 1.280000e+02 : f32
    %11 = vector.broadcast %cst_4 : f32 to vector<64x1xf32>
    %12 = arith.divf %10, %11 : vector<64x1xf32>
    %cst_5 = arith.constant 9.99999996E-13 : f32
    %13 = vector.broadcast %cst_5 : f32 to vector<64x1xf32>
    %14 = arith.addf %12, %13 : vector<64x1xf32>
    %15 = math.rsqrt %14 : vector<64x1xf32>
    %16 = vector.broadcast %15 : vector<64x1xf32> to vector<64x128xf32>
    %17 = arith.mulf %7, %16 : vector<64x128xf32>
    %c0_6 = arith.constant 0 : index
    %c0_7 = arith.constant 0 : index
    %18 = vector.load %arg3[%c0_6, %c0_7] : memref<1x128xf32, #tpu.memory_space<vmem>>, vector<1x128xf32>
    %19 = vector.broadcast %18 : vector<1x128xf32> to vector<64x128xf32>
    %20 = arith.mulf %17, %19 : vector<64x128xf32>
    %c0_8 = arith.constant 0 : index
    %c0_9 = arith.constant 0 : index
    %21 = vector.load %arg4[%c0_8, %c0_9] : memref<1x128xf32, #tpu.memory_space<vmem>>, vector<1x128xf32>
    %22 = vector.broadcast %21 : vector<1x128xf32> to vector<64x128xf32>
    %23 = arith.addf %20, %22 : vector<64x128xf32>
    %c0_10 = arith.constant 0 : index
    %c0_11 = arith.constant 0 : index
    %24 = vector.load %arg5[%c0_10, %c0_11] : memref<128x128xf32, #tpu.memory_space<vmem>>, vector<128x128xf32>
    %cst_12 = arith.constant dense<0.000000e+00> : vector<64x128xf32>
    %25 = tpu.matmul %23, %24, %cst_12 {dimension_numbers = #tpu.dot_dimension_numbers<[1], [0], [0], [1], [0, 0, 1, 1], [], []>} : vector<64x128xf32>, vector<128x128xf32>, vector<64x128xf32> -> vector<64x128xf32>
    %c0_13 = arith.constant 0 : index
    %c0_14 = arith.constant 0 : index
    %26 = vector.load %arg6[%c0_13, %c0_14] : memref<1x128xf32, #tpu.memory_space<vmem>>, vector<1x128xf32>
    %27 = vector.broadcast %26 : vector<1x128xf32> to vector<64x128xf32>
    %28 = arith.addf %25, %27 : vector<64x128xf32>
    %cst_15 = arith.constant 5.000000e-01 : f32
    %29 = vector.broadcast %cst_15 : f32 to vector<64x128xf32>
    %30 = arith.mulf %29, %28 : vector<64x128xf32>
    %cst_16 = arith.constant 4.471500e-02 : f32
    %31 = vector.broadcast %cst_16 : f32 to vector<64x128xf32>
    %32 = arith.mulf %31, %28 : vector<64x128xf32>
    %33 = arith.mulf %32, %28 : vector<64x128xf32>
    %34 = arith.mulf %33, %28 : vector<64x128xf32>
    %35 = arith.addf %28, %34 : vector<64x128xf32>
    %cst_17 = arith.constant 0.797884583 : f32
    %36 = vector.broadcast %cst_17 : f32 to vector<64x128xf32>
    %37 = arith.mulf %36, %35 : vector<64x128xf32>
    %38 = math.tanh %37 : vector<64x128xf32>
    %cst_18 = arith.constant 1.000000e+00 : f32
    %39 = vector.broadcast %cst_18 : f32 to vector<64x128xf32>
    %40 = arith.addf %39, %38 : vector<64x128xf32>
    %41 = arith.mulf %30, %40 : vector<64x128xf32>
    %c0_19 = arith.constant 0 : index
    %c0_20 = arith.constant 0 : index
    %42 = vector.load %arg7[%c0_19, %c0_20] : memref<128x64xf32, #tpu.memory_space<vmem>>, vector<128x64xf32>
    %cst_21 = arith.constant dense<0.000000e+00> : vector<64x64xf32>
    %43 = tpu.matmul %41, %42, %cst_21 {dimension_numbers = #tpu.dot_dimension_numbers<[1], [0], [0], [1], [0, 0, 1, 1], [], []>} : vector<64x128xf32>, vector<128x64xf32>, vector<64x64xf32> -> vector<64x64xf32>
    %c0_22 = arith.constant 0 : index
    %c0_23 = arith.constant 0 : index
    %44 = vector.load %arg8[%c0_22, %c0_23] : memref<1x64xf32, #tpu.memory_space<vmem>>, vector<1x64xf32>
    %45 = vector.broadcast %44 : vector<1x64xf32> to vector<64x64xf32>
    %46 = arith.addf %43, %45 : vector<64x64xf32>
    %cst_24 = arith.constant 5.000000e-01 : f32
    %47 = vector.broadcast %cst_24 : f32 to vector<64x64xf32>
    %48 = arith.mulf %47, %46 : vector<64x64xf32>
    %cst_25 = arith.constant 4.471500e-02 : f32
    %49 = vector.broadcast %cst_25 : f32 to vector<64x64xf32>
    %50 = arith.mulf %49, %46 : vector<64x64xf32>
    %51 = arith.mulf %50, %46 : vector<64x64xf32>
    %52 = arith.mulf %51, %46 : vector<64x64xf32>
    %53 = arith.addf %46, %52 : vector<64x64xf32>
    %cst_26 = arith.constant 0.797884583 : f32
    %54 = vector.broadcast %cst_26 : f32 to vector<64x64xf32>
    %55 = arith.mulf %54, %53 : vector<64x64xf32>
    %56 = math.tanh %55 : vector<64x64xf32>
    %cst_27 = arith.constant 1.000000e+00 : f32
    %57 = vector.broadcast %cst_27 : f32 to vector<64x64xf32>
    %58 = arith.addf %57, %56 : vector<64x64xf32>
    %59 = arith.mulf %48, %58 : vector<64x64xf32>
    %c0_28 = arith.constant 0 : index
    %c0_29 = arith.constant 0 : index
    %c0_30 = arith.constant 0 : index
    %c0_31 = arith.constant 0 : index
    %60 = vector.load %arg2[%c0_28, %c0_29, %c0_30, %c0_31] : memref<1x4x64x64xf32, #tpu.memory_space<vmem>>, vector<1x4x64x64xf32>
    %61 = vector.shape_cast %60 : vector<1x4x64x64xf32> to vector<4x64x64xf32>
    %cst_32 = arith.constant dense<0.000000e+00> : vector<64x64xf32>
    %62 = vector.multi_reduction <add>, %61, %cst_32 [0] : vector<4x64x64xf32> to vector<64x64xf32>
    %cst_33 = arith.constant 4.000000e+00 : f32
    %63 = vector.broadcast %cst_33 : f32 to vector<64x64xf32>
    %64 = arith.divf %62, %63 : vector<64x64xf32>
    %cst_34 = arith.constant dense<0.000000e+00> : vector<64x128xf32>
    %65 = tpu.matmul %64, %1, %cst_34 {dimension_numbers = #tpu.dot_dimension_numbers<[1], [0], [0], [1], [0, 0, 1, 1], [], []>} : vector<64x64xf32>, vector<64x128xf32>, vector<64x128xf32> -> vector<64x128xf32>
    %c0_35 = arith.constant 0 : index
    %c0_36 = arith.constant 0 : index
    %66 = vector.load %arg9[%c0_35, %c0_36] : memref<128x64xf32, #tpu.memory_space<vmem>>, vector<128x64xf32>
    %cst_37 = arith.constant dense<0.000000e+00> : vector<64x64xf32>
    %67 = tpu.matmul %65, %66, %cst_37 {dimension_numbers = #tpu.dot_dimension_numbers<[1], [0], [0], [1], [0, 0, 1, 1], [], []>} : vector<64x128xf32>, vector<128x64xf32>, vector<64x64xf32> -> vector<64x64xf32>
    %c0_38 = arith.constant 0 : index
    %c0_39 = arith.constant 0 : index
    %68 = vector.load %arg10[%c0_38, %c0_39] : memref<1x64xf32, #tpu.memory_space<vmem>>, vector<1x64xf32>
    %69 = vector.broadcast %68 : vector<1x64xf32> to vector<64x64xf32>
    %70 = arith.addf %67, %69 : vector<64x64xf32>
    %cst_40 = arith.constant 5.000000e-01 : f32
    %71 = vector.broadcast %cst_40 : f32 to vector<64x64xf32>
    %72 = arith.mulf %71, %70 : vector<64x64xf32>
    %cst_41 = arith.constant 4.471500e-02 : f32
    %73 = vector.broadcast %cst_41 : f32 to vector<64x64xf32>
    %74 = arith.mulf %73, %70 : vector<64x64xf32>
    %75 = arith.mulf %74, %70 : vector<64x64xf32>
    %76 = arith.mulf %75, %70 : vector<64x64xf32>
    %77 = arith.addf %70, %76 : vector<64x64xf32>
    %cst_42 = arith.constant 0.797884583 : f32
    %78 = vector.broadcast %cst_42 : f32 to vector<64x64xf32>
    %79 = arith.mulf %78, %77 : vector<64x64xf32>
    %80 = math.tanh %79 : vector<64x64xf32>
    %cst_43 = arith.constant 1.000000e+00 : f32
    %81 = vector.broadcast %cst_43 : f32 to vector<64x64xf32>
    %82 = arith.addf %81, %80 : vector<64x64xf32>
    %83 = arith.mulf %72, %82 : vector<64x64xf32>
    %c0_44 = arith.constant 0 : index
    %c0_45 = arith.constant 0 : index
    %84 = vector.load %arg11[%c0_44, %c0_45] : memref<64x16xf32, #tpu.memory_space<vmem>>, vector<64x16xf32>
    %cst_46 = arith.constant dense<0.000000e+00> : vector<64x16xf32>
    %85 = tpu.matmul %59, %84, %cst_46 {dimension_numbers = #tpu.dot_dimension_numbers<[1], [0], [0], [1], [0, 0, 1, 1], [], []>} : vector<64x64xf32>, vector<64x16xf32>, vector<64x16xf32> -> vector<64x16xf32>
    %c0_47 = arith.constant 0 : index
    %c0_48 = arith.constant 0 : index
    %86 = vector.load %arg12[%c0_47, %c0_48] : memref<64x16xf32, #tpu.memory_space<vmem>>, vector<64x16xf32>
    %cst_49 = arith.constant dense<0.000000e+00> : vector<64x16xf32>
    %87 = tpu.matmul %83, %86, %cst_49 {dimension_numbers = #tpu.dot_dimension_numbers<[1], [0], [0], [1], [0, 0, 1, 1], [], []>} : vector<64x64xf32>, vector<64x16xf32>, vector<64x16xf32> -> vector<64x16xf32>
    %88 = arith.addf %85, %87 : vector<64x16xf32>
    %c0_50 = arith.constant 0 : index
    %c0_51 = arith.constant 0 : index
    %89 = vector.load %arg13[%c0_50, %c0_51] : memref<1x16xf32, #tpu.memory_space<vmem>>, vector<1x16xf32>
    %90 = vector.broadcast %89 : vector<1x16xf32> to vector<64x16xf32>
    %91 = arith.addf %88, %90 : vector<64x16xf32>
    %c0_52 = arith.constant 0 : index
    %c0_53 = arith.constant 0 : index
    %c0_54 = arith.constant 0 : index
    %92 = vector.load %arg14[%c0_52, %c0_53, %c0_54] : memref<1x64x16xf32, #tpu.memory_space<vmem>>, vector<1x64x16xf32>
    %93 = vector.shape_cast %92 : vector<1x64x16xf32> to vector<64x16xf32>
    %94 = vector.shape_cast %91 : vector<64x16xf32> to vector<1x64x16xf32>
    tpu.vector_store %arg14[%c0_52, %c0_53, %c0_54], %94 {strides = array<i32>} : memref<1x64x16xf32, #tpu.memory_space<vmem>>, vector<1x64x16xf32>,
    return
  }
  func.func @transform_0(%arg0: i32) -> (i32, i32, i32) {
    %c0_i32 = arith.constant 0 : i32
    %c0_i32_0 = arith.constant 0 : i32
    %c0_i32_1 = arith.constant 0 : i32
    return %arg0, %c0_i32, %c0_i32_0 : i32, i32, i32
  }
  func.func @transform_1(%arg0: i32) -> (i32, i32, i32, i32) {
    %c0_i32 = arith.constant 0 : i32
    %c0_i32_0 = arith.constant 0 : i32
    %c0_i32_1 = arith.constant 0 : i32
    %c0_i32_2 = arith.constant 0 : i32
    return %arg0, %c0_i32, %c0_i32_0, %c0_i32_1 : i32, i32, i32, i32
  }
  func.func @transform_2(%arg0: i32) -> (i32, i32) {
    %c0_i32 = arith.constant 0 : i32
    %c0_i32_0 = arith.constant 0 : i32
    %c0_i32_1 = arith.constant 0 : i32
    return %c0_i32, %c0_i32_0 : i32, i32
  }
  func.func @transform_3(%arg0: i32) -> (i32, i32) {
    %c0_i32 = arith.constant 0 : i32
    %c0_i32_0 = arith.constant 0 : i32
    %c0_i32_1 = arith.constant 0 : i32
    return %c0_i32, %c0_i32_0 : i32, i32
  }
  func.func @transform_4(%arg0: i32) -> (i32, i32) {
    %c0_i32 = arith.constant 0 : i32
    %c0_i32_0 = arith.constant 0 : i32
    %c0_i32_1 = arith.constant 0 : i32
    return %c0_i32, %c0_i32_0 : i32, i32
  }
  func.func @transform_5(%arg0: i32) -> (i32, i32) {
    %c0_i32 = arith.constant 0 : i32
    %c0_i32_0 = arith.constant 0 : i32
    %c0_i32_1 = arith.constant 0 : i32
    return %c0_i32, %c0_i32_0 : i32, i32
  }
  func.func @transform_6(%arg0: i32) -> (i32, i32) {
    %c0_i32 = arith.constant 0 : i32
    %c0_i32_0 = arith.constant 0 : i32
    %c0_i32_1 = arith.constant 0 : i32
    return %c0_i32, %c0_i32_0 : i32, i32
  }
  func.func @transform_7(%arg0: i32) -> (i32, i32) {
    %c0_i32 = arith.constant 0 : i32
    %c0_i32_0 = arith.constant 0 : i32
    %c0_i32_1 = arith.constant 0 : i32
    return %c0_i32, %c0_i32_0 : i32, i32
  }
  func.func @transform_8(%arg0: i32) -> (i32, i32) {
    %c0_i32 = arith.constant 0 : i32
    %c0_i32_0 = arith.constant 0 : i32
    %c0_i32_1 = arith.constant 0 : i32
    return %c0_i32, %c0_i32_0 : i32, i32
  }
  func.func @transform_9(%arg0: i32) -> (i32, i32) {
    %c0_i32 = arith.constant 0 : i32
    %c0_i32_0 = arith.constant 0 : i32
    %c0_i32_1 = arith.constant 0 : i32
    return %c0_i32, %c0_i32_0 : i32, i32
  }
  func.func @transform_10(%arg0: i32) -> (i32, i32) {
    %c0_i32 = arith.constant 0 : i32
    %c0_i32_0 = arith.constant 0 : i32
    %c0_i32_1 = arith.constant 0 : i32
    return %c0_i32, %c0_i32_0 : i32, i32
  }
  func.func @transform_11(%arg0: i32) -> (i32, i32) {
    %c0_i32 = arith.constant 0 : i32
    %c0_i32_0 = arith.constant 0 : i32
    %c0_i32_1 = arith.constant 0 : i32
    return %c0_i32, %c0_i32_0 : i32, i32
  }
  func.func @transform_12(%arg0: i32) -> (i32, i32) {
    %c0_i32 = arith.constant 0 : i32
    %c0_i32_0 = arith.constant 0 : i32
    %c0_i32_1 = arith.constant 0 : i32
    return %c0_i32, %c0_i32_0 : i32, i32
  }
  func.func @transform_13(%arg0: i32) -> (i32, i32, i32) {
    %c0_i32 = arith.constant 0 : i32
    %c0_i32_0 = arith.constant 0 : i32
    %c0_i32_1 = arith.constant 0 : i32
    return %arg0, %c0_i32, %c0_i32_0 : i32, i32, i32
  }
}

</mosaic_0001>

<bundles_post_ra>
// kernel: tpu_custom_call.1
= control target key start
LH: loop header
LB: loop body
LE: loop exit
PB: predicated region body
PF: predicated region fallthrough
CT: control target
= control target key end

     0   :  { %s3403_s0 = inlined_call_operand.hbm [shape: f32[2,64,128], index: 0, kind: input, shape index: {}]   ;;  %s3404_s1 = inlined_call_operand.vmem [shape: f32[2,4,64,64], index: 1, kind: input, shape index: {}]   ;;  %s3405_s2 = inlined_call_operand.vmem [shape: f32[1,128], index: 2, kind: input, shape index: {}]   ;;  %s3406_s3 = inlined_call_operand.vmem [shape: f32[1,128], index: 3, kind: input, shape index: {}]   ;;  %s3407_s4 = inlined_call_operand.hbm [shape: f32[128,128], index: 4, kind: input, shape index: {}]   ;;  %s3408_s5 = inlined_call_operand.vmem [shape: f32[1,128], index: 5, kind: input, shape index: {}]   ;;  %s3409_s6 = inlined_call_operand.vmem [shape: f32[128,64], index: 6, kind: input, shape index: {}]   ;;  %s3410_s7 = inlined_call_operand.vmem [shape: f32[1,64], index: 7, kind: input, shape index: {}]   ;;  %s3411_s8 = inlined_call_operand.vmem [shape: f32[128,64], index: 8, kind: input, shape index: {}]   ;;  %s3412_s9 = inlined_call_operand.vmem [shape: f32[1,64], index: 9, kind: input, shape index: {}]   ;;  %s3413_s10 = inlined_call_operand.vmem [shape: f32[64,16], index: 10, kind: input, shape index: {}]   ;;  %s3414_s11 = inlined_call_operand.vmem [shape: f32[64,16], index: 11, kind: input, shape index: {}]   ;;  %s3415_s12 = inlined_call_operand.vmem [shape: f32[1,16], index: 12, kind: input, shape index: {}]   ;;  %s3416_s13 = inlined_call_operand.vmem [shape: f32[2,64,16], index: 13, kind: output, shape index: {}]  }
   0x1   :  { %3422 = sst [smem:[#allocation9_spill]] %s3412_s9 }
   0x2   :  { %3423 = sst [smem:[#allocation10_spill]] %s3415_s12 }
   0x3   :  { %3424 = sst [smem:[#allocation11_spill]] %s3416_s13 }
   0x4   :  { %18 = vsyncpa [#allocation3], 0 }
   0x5   :  { %20 = vsyncpa [#allocation3 + $0x1], 0 }
   0x6   :  { %21 = vsyncpa [#allocation5], 0  ;;  %s2670_s25 = smov 0   ;;  %s2672_s26 = smov 0  }
   0x7   :  { %s2674_s27 = smov 0   ;;  %s2676_s28 = smov 0  }
   0x8 LB: > { %s2689_s29 = sadd.s32 4294967295, %s2594_s28   ;;  %p47_p0 = scmp.ne.s32.totalorder %s2586_s26, %s2582_s25  ;;  %s2594_s28 = sphi %s2676_s28, %s3437_s28   ;;  %s2590_s27 = sphi %s2674_s27, %s3440_s27   ;;  %s2586_s26 = sphi %s2672_s26, %s3439_s26   ;;  %s2582_s25 = sphi %s2670_s25, %s3438_s25  }
   0x9   : > { %p3417_p1 = scmp.eq.s32.totalorder %s2689_s29, 0  ;;  %p1838_p2 = scmp.ge.s32.totalorder %s2594_s28, 1 }
   0xa   : > { %p341_p3 = scmp.lt.s32.totalorder %s2594_s28, 3  ;;  %s2596_s15 = smov [#allocation4]  }
   0xb   : > { %p2697_p4 = por %p3417_p1, %p47_p0  ;;  %s359_s16 = sshll.u32 %s2596_s15, 4  ;;  %s360_s16 = int_to_ptr.vmem [resolvable:$true] %s359_s16 }
   0xc   : > { %p2701_p5 = pnand %p1838_p2, %p341_p3  ;;  %s2714_s18 = sadd.s32 1, %s2594_s28  }
   0xd   : > { %s3425_s30 = scalar_select %p2697_p4, 1, 0 }
   0xe   : > { %s3426_s14 = scalar_select %p2701_p5, 1, 0 }
   0xf   : > { %p2388_p6 = pneg %p2701_p5  ;;  %3428 = sst [smem:[#allocation8_spill]] %s2714_s18 }
  0x10   : > { %s34_s19 = sadd.s32 1, %s2590_s27  ;;  %s31_s20 = ssub.s32 %s2594_s28, %s2714_s18 }
  0x11   : > { %p2709_p7 = pnand %p2388_p6, %p3417_p1  ;;  %s2498_s23 = scalar_lea.hbm %s3407_s4, 2048 }
  0x12   : > { %p2499_p8 = scmp.ne.s32.totalorder %s3407_s4, %s2498_s23  ;;  %p2505_p12 = scmp.lt.u32.totalorder %s2498_s23, %s3407_s4 }
  0x13   : > { %p2500_p9 = pneg %p2709_p7 }
  0x15   : > { %p2501_p10 = pnand %p2500_p9, %p2499_p8 }
  0x17   : > { %p2502_p11 = pneg %p2501_p10 }
  0x19   : > { %p2507_p13 = pnand %p2505_p12, %p2502_p11 }
  0x1b   : > { %2510 = shalt.err (!%p2507_p13)
}
  0x1c   : > { %s2511_s12 = scalar_lea.vmem %s360_s16, 2048  ;;  %p2519_p6 = scmp.lt.s32.totalorder %s360_s16, %s360_s16 }
  0x1d   : > { %p2512_p0 = scmp.ne.s32.totalorder %s360_s16, %s2511_s12  ;;  %p2520_p1 = scmp.lt.s32.totalorder %s2511_s12, %s2511_s12 }
  0x1f   : > { %p2514_p2 = pnand %p2512_p0, %p2500_p9  ;;  %p2521_p4 = por %p2520_p1, %p2519_p6 }
  0x21   : > { %p2515_p3 = pneg %p2514_p2 }
  0x23   : > { %p2522_p5 = pnand %p2521_p4, %p2515_p3 }
  0x25   : > { %2525 = shalt.err (!%p2522_p5)
}
  0x26   : > { %s2597_s21 = smov 128   ;;  %s2598_s13 = smov 8  }
  0x27   : > { %2391 = dma.hbm_to_vmem [thread:$0]  (!%p2709_p7), %s3407_s4, 2048, %s360_s16, [#allocation5], %s2597_s21, %s2597_s21, %s2598_s13  }
  0x28   : > { %p32_p1 = scmp.eq.s32.totalorder %s31_s20, 0  ;;  %p41_p4 = scmp.ne.s32.totalorder %s2590_s27, %s2586_s26 }
  0x29   : > { %p42_p5 = scmp.eq.s32.totalorder %s2594_s28, 0  ;;  %p2397_p8 = scmp.lt.s32.totalorder %s2594_s28, 2 }
  0x2a   : > { %s2743_s12 = scalar_select %p32_p1, %s2590_s27, %s34_s19  }
  0x2b   : > { %p43_p9 = por %p42_p5, %p41_p4  ;;  %s397_s24 = sand.u32 1, %s2590_s27  }
  0x2c   : > { %s1841_s25 = sshll.u32 %s397_s24, 6  ;;  %s1883_s15 = sshll.u32 %s2594_s28, 10 }
  0x2d   : > { %s2750_s17 = scalar_lea.hbm %s3403_s0, %s1883_s15  ;;  %s401_s16 = scalar_lea.vmem [#allocation2], %s1841_s25 }
  0x2e   : > { %s408_s20 = sshll.u32 %s401_s16, 4  ;;  %p2754_p7 = pnand %p2397_p8, %p43_p9  ;;  %s2752_s20 = int_to_ptr.vmem [resolvable:$true] %s408_s20 }
  0x2f   : > { %s2758_s28 = scalar_lea.sflag [#allocation3], %s397_s24  ;;  %s2526_s22 = scalar_lea.hbm %s2750_s17, 1024 }
  0x30   : > { %p2527_p10 = scmp.ne.s32.totalorder %s2750_s17, %s2526_s22  ;;  %p2528_p11 = pneg %p2754_p7 }
  0x31   : > { %s2531_s23 = scalar_lea.hbm %s3403_s0, 2048  ;;  %p2532_p0 = scmp.lt.u32.totalorder %s2750_s17, %s3403_s0 }
  0x32   : > { %p2529_p12 = pnand %p2528_p11, %p2527_p10  ;;  %p2533_p2 = scmp.lt.u32.totalorder %s2531_s23, %s2526_s22 }
  0x33   : > { %p2535_p6 = scmp.lt.u32.totalorder %s2526_s22, %s2750_s17 }
  0x34   : > { %p2530_p13 = pneg %p2529_p12  ;;  %p2534_p3 = por %p2533_p2, %p2532_p0 }
  0x36   : > { %p2536_p1 = por %p2535_p6, %p2534_p3 }
  0x38   : > { %p2537_p4 = pnand %p2536_p1, %p2530_p13 }
  0x3a   : > { %2540 = shalt.err (!%p2537_p4)
}
  0x3b   : > { %s2541_s24 = scalar_lea.vmem %s2752_s20, 1024  ;;  %s2599_s16 = smov [#allocation2]  }
  0x3c   : > { %p2542_p5 = scmp.ne.s32.totalorder %s2752_s20, %s2541_s24  ;;  %s2546_s9 = sshll.u32 %s2599_s16, 4  ;;  %s2547_s9 = int_to_ptr.vmem [resolvable:$false] %s2546_s9 }
  0x3d   : > { %s2548_s18 = scalar_lea.vmem %s2547_s9, 2048  ;;  %p2549_p10 = scmp.lt.s32.totalorder %s2752_s20, %s2547_s9 }
  0x3e   : > { %p2544_p8 = pnand %p2542_p5, %p2528_p11  ;;  %p2550_p12 = scmp.lt.s32.totalorder %s2548_s18, %s2541_s24 }
  0x40   : > { %p2545_p9 = pneg %p2544_p8  ;;  %p2551_p0 = por %p2550_p12, %p2549_p10 }
  0x42   : > { %p2552_p2 = pnand %p2551_p0, %p2545_p9 }
  0x44   : > { %2555 = shalt.err (!%p2552_p2)
}
  0x45   : > { %2395 = dma.hbm_to_vmem [thread:$0]  (!%p2754_p7), %s2750_s17, 1024, %s2752_s20, %s2758_s28, %s2597_s21, %s2597_s21, %s2598_s13  }
  0x46   : > { %p3430_p11 = scmp.ne.s32.totalorder %s3426_s14, 0 }
  0x47   : > { %s430_s22 = sand.u32 (!%p3430_p11), 1, %s2586_s26   ;;  %p3431_p13 = scmp.ne.s32.totalorder (!%p3430_p11), %s3425_s30, 0 }
  0x48   : > { %428 = sbr.rel (%p3430_p11) target bundleno = 1149 (0x47d), region = 72  ;;  %s1845_s23 = sshll.u32 (!%p3430_p11), %s430_s22, 6 }
  0x49   : > { %s431_s25 = scalar_lea.sflag (!%p3430_p11), [#allocation3], %s430_s22  ;;  %s434_s15 = scalar_lea.vmem (!%p3430_p11), [#allocation2], %s1845_s23 }
  0x4f   : > { %2573 = dma.done.wait (%p3431_p13), %s431_s25, 1024  }
  0x50   : > { %2575 = vsyncadd (%p3431_p13), %s431_s25, 4294966272  ;;  %p3432_p3 = scmp.eq.s32.totalorder %s2689_s29, 0 }
  0x52   : > { %2577 = dma.done.wait (%p3432_p3), [#allocation5], 2048   ;;  %p3433_p6 = pmov %p3432_p3 }
  0x53   : > { %v2800_v0 = vld [vmem:[%s434_s15] sm:$0xff]  ;;  %v2802_v1 = vld [vmem:[%s434_s15 + $0x10] sm:$0xff]  ;;  %v2806_v2 = vld [vmem:[%s434_s15 + $0x8] sm:$0xff]  ;;  %p486_p7 = scmp.lt.s32.totalorder %s2689_s29, 1  ;;  %vm1055_vm0 = vcmask 523264   ;;  %s3434_s25 = sld [smem:[#allocation9_spill]] }
  0x54   : > { %2579 = vsyncadd (%p3433_p6), [#allocation5], 4294965248  ;;  %504 = vadd.xlane.f32.xlu0 %v2800_v0  ;;  %508 = vadd.xlane.f32.xlu1 %v2802_v1  ;;  %v2808_v3 = vld [vmem:[%s434_s15 + $0x18] sm:$0xff]  ;;  %v2812_v4 = vld [vmem:[%s434_s15 + $0x20] sm:$0xff]  ;;  %s3435_s21 = sld [smem:[#allocation10_spill]]  ;;  %s3436_s20 = sld [smem:[#allocation11_spill]] }
  0x55   : > { %v2814_v5 = vld [vmem:[%s434_s15 + $0x28] sm:$0xff]  ;;  %v2818_v6 = vld [vmem:[%s434_s15 + $0x30] sm:$0xff]  ;;  %v2820_v7 = vld [vmem:[%s434_s15 + $0x38] sm:$0xff]  ;;  %s3442_s29 = smov (!%p486_p7, %s2689_s29), 1  ;;  %vm1739_vm1 = vcmask 130048  }
  0x56   : > { %v623_v8 = vld [vmem:[#allocation4] sm:$0xff]  ;;  %v624_v9 = vld [vmem:[#allocation4 + $0x8] sm:$0xff]  ;;  %v625_v10 = vld [vmem:[#allocation4 + $0x10] sm:$0xff]  ;;  %s1884_s17 = sshll.u32 %s3442_s29, 8  ;;  %s1885_s15 = sshll.u32 %s3442_s29, 6 }
  0x57   : > { %v2222_v11 = vpack.c.bf16 %v624_v9, %v623_v8  ;;  %v626_v12 = vld [vmem:[#allocation4 + $0x18] sm:$0xff]  ;;  %v627_v46 = vld [vmem:[#allocation4 + $0x20] sm:$0xff]  ;;  %v628_v47 = vld [vmem:[#allocation4 + $0x28] sm:$0xff]  ;;  %v2866_v8 = vpack.c.bf16 %v2806_v2, %v2800_v0  ;;  %s2883_s28 = scalar_lea.vmem %s3404_s1, %s1884_s17 }
  0x58   : > { %506 = vadd.xlane.f32.xlu0 %v2806_v2  ;;  %510 = vadd.xlane.f32.xlu1 %v2808_v3  ;;  %v2226_v13 = vpack.c.bf16 %v626_v12, %v625_v10  ;;  %v2230_v48 = vpack.c.bf16 %v628_v47, %v627_v46  ;;  %v629_v49 = vld [vmem:[#allocation4 + $0x30] sm:$0xff]  ;;  %v630_v50 = vld [vmem:[#allocation4 + $0x38] sm:$0xff]  ;;  %v631_v52 = vld [vmem:[#allocation4 + $0x40] sm:$0xff] }
  0x59   : > { %2223 = vmatprep.subr.bf16.mxu0 %v2222_v11  ;;  %v2234_v51 = vpack.c.bf16 %v630_v50, %v629_v49  ;;  %v632_v53 = vld [vmem:[#allocation4 + $0x48] sm:$0xff]  ;;  %v633_v55 = vld [vmem:[#allocation4 + $0x50] sm:$0xff]  ;;  %v634_v56 = vld [vmem:[#allocation4 + $0x58] sm:$0xff] }
  0x5a   : > { %2225 = vmatpush3.bf16.msra.mxu0 %v2222_v11  ;;  %v2238_v54 = vpack.c.bf16 %v632_v53, %v631_v52  ;;  %v2242_v57 = vpack.c.bf16 %v634_v56, %v633_v55  ;;  %v635_v58 = vld [vmem:[#allocation4 + $0x60] sm:$0xff]  ;;  %v636_v59 = vld [vmem:[#allocation4 + $0x68] sm:$0xff]  ;;  %v637_v61 = vld [vmem:[#allocation4 + $0x70] sm:$0xff]  ;;  %s495_s19 = scalar_lea.vmem %s3436_s20, %s1885_s15 }
  0x5b   : > { %2227 = vmatprep.subr.bf16.mxu0 %v2226_v13  ;;  %v2246_v60 = vpack.c.bf16 %v636_v59, %v635_v58  ;;  %v638_v62 = vld [vmem:[#allocation4 + $0x78] sm:$0xff]  ;;  %v823_v9 = vld [vmem:[%s3409_s6] sm:$0xff]  ;;  %v824_v10 = vld [vmem:[%s3409_s6 + $0x8] sm:$0xff] }
  0x5c   : > { %512 = vadd.xlane.f32.xlu0 %v2812_v4  ;;  %514 = vadd.xlane.f32.xlu1 %v2814_v5  ;;  %v2250_v63 = vpack.c.bf16 %v638_v62, %v637_v61  ;;  %v2254_v11 = vpack.c.bf16 %v824_v10, %v823_v9  ;;  %v1024_v49 = vld [vmem:[%s2883_s28 + $0x8] sm:$0xff]  ;;  %v1039_v52 = vld [vmem:[%s2883_s28 + $0x80] sm:$0xff]  ;;  %v1025_v61 = vld [vmem:[%s2883_s28 + $0x10] sm:$0xff]  ;;  %v2914_v9 = vpack.c.bf16 %v2808_v3, %v2802_v1 }
  0x5d   : > { %v1032_v50 = vld [vmem:[%s2883_s28 + $0x48] sm:$0xff]  ;;  %v1063_v59 = vsel %vm1055_vm0, %v1024_v49, 0.0  ;;  %v1033_v62 = vld [vmem:[%s2883_s28 + $0x50] sm:$0xff]  ;;  %v1059_v10 = vsel %vm1055_vm0, %v1039_v52, 0.0 }
  0x5e   : > { %2229 = vmatpush3.bf16.msra.mxu0 %v2226_v13  ;;  %2255 = vmatprep.subr.bf16.mxu1 %v2254_v11  ;;  %v1036_v52 = vld [vmem:[%s2883_s28 + $0x68] sm:$0xff] }
  0x5f   : > { %2231 = vmatprep.subr.bf16.mxu0 %v2230_v48  ;;  %2257 = vmatpush3.bf16.msra.mxu1 %v2254_v11  ;;  %v1040_v11 = vld [vmem:[%s2883_s28 + $0x88] sm:$0xff] }
  0x60   : > { %516 = vadd.xlane.f32.xlu0 %v2818_v6  ;;  %518 = vadd.xlane.f32.xlu1 %v2820_v7 }
  0x62   : > { %2233 = vmatpush3.bf16.msra.mxu0 %v2230_v48  ;;  %v2898_v48 = vld [vmem:[%s3406_s3] ss:$0 sm:$0xff] }
  0x63   : > { %2235 = vmatprep.subr.bf16.mxu0 %v2234_v51 }
  0x66   : > { %2237 = vmatpush3.bf16.msra.mxu0 %v2234_v51 }
  0x67   : > { %2239 = vmatprep.subr.bf16.mxu0 %v2238_v54 }
  0x6a   : > { %2241 = vmatpush3.bf16.msra.mxu0 %v2238_v54  ;;  %v1047_v54 = vld [vmem:[%s2883_s28 + $0xc0] sm:$0xff] }
  0x6b   : > { %2243 = vmatprep.subr.bf16.mxu0 %v2242_v57 }
  0x6e   : > { %2245 = vmatpush3.bf16.msra.mxu0 %v2242_v57 }
  0x6f   : > { %2247 = vmatprep.subr.bf16.mxu0 %v2246_v60 }
  0x72   : > { %2249 = vmatpush3.bf16.msra.mxu0 %v2246_v60  ;;  %v1064_v60 = vsel %vm1055_vm0, %v1032_v50, 0.0 }
  0x73   : > { %2251 = vmatprep.subr.bf16.mxu0 %v2250_v63 }
  0x76   : > { %2253 = vmatpush3.bf16.msra.mxu0 %v2250_v63 }
  0x77   : > { %2287 = vmatprep.subr.bf16.mxu0 %v2866_v8 }
  0xe1   : > { %v505_v14 = vpop.xlane.xlu0 %504  ;;  %v509_v15 = vpop.xlane.xlu1 %508 }
  0xe2   : > { %v521_v16 = vmul.f32 0.0078125, %v505_v14  ;;  %v523_v17 = vmul.f32 0.0078125, %v509_v15 }
  0xe4   : > { %v2825_v18 = vsub.f32 %v2800_v0, %v521_v16  ;;  %v2828_v19 = vsub.f32 %v2802_v1, %v523_v17  ;;  %v1048_v1 = vld [vmem:[%s2883_s28 + $0xc8] sm:$0xff] }
  0xe5   : > { %v507_v20 = vpop.xlane.xlu0 %506  ;;  %v511_v21 = vpop.xlane.xlu1 %510 }
  0xe6   : > { %v522_v22 = vmul.f32 0.0078125, %v507_v20  ;;  %v537_v23 = vmul.f32 %v2825_v18, %v2825_v18  ;;  %v524_v24 = vmul.f32 0.0078125, %v511_v21  ;;  %v539_v27 = vmul.f32 %v2828_v19, %v2828_v19 }
  0xe8   : > { %v2833_v25 = vsub.f32 %v2806_v2, %v522_v22  ;;  %545 = vadd.xlane.f32.xlu0 %v537_v23  ;;  %v2836_v26 = vsub.f32 %v2808_v3, %v524_v24  ;;  %v1041_v3 = vld [vmem:[%s2883_s28 + $0x90] sm:$0xff] }
  0xe9   : > { %v513_v28 = vpop.xlane.xlu0 %512  ;;  %v515_v29 = vpop.xlane.xlu1 %514 }
  0xea   : > { %v525_v30 = vmul.f32 0.0078125, %v513_v28  ;;  %v538_v31 = vmul.f32 %v2833_v25, %v2833_v25  ;;  %v526_v32 = vmul.f32 0.0078125, %v515_v29  ;;  %v540_v35 = vmul.f32 %v2836_v26, %v2836_v26 }
  0xec   : > { %v2843_v33 = vsub.f32 %v2812_v4, %v525_v30  ;;  %549 = vadd.xlane.f32.xlu0 %v539_v27  ;;  %547 = vadd.xlane.f32.xlu1 %v538_v31  ;;  %v2846_v34 = vsub.f32 %v2814_v5, %v526_v32 }
  0xed   : > { %v517_v36 = vpop.xlane.xlu0 %516  ;;  %v519_v37 = vpop.xlane.xlu1 %518 }
  0xee   : > { %v527_v38 = vmul.f32 0.0078125, %v517_v36  ;;  %v541_v39 = vmul.f32 %v2843_v33, %v2843_v33  ;;  %v528_v40 = vmul.f32 0.0078125, %v519_v37  ;;  %v542_v43 = vmul.f32 %v2846_v34, %v2846_v34  ;;  %v1031_v36 = vld [vmem:[%s2883_s28 + $0x40] sm:$0xff] }
  0xef   : > { %v1057_v46 = vsel %vm1055_vm0, %v1031_v36, 0.0 }
  0xf0   : > { %v2853_v41 = vsub.f32 %v2818_v6, %v527_v38  ;;  %551 = vadd.xlane.f32.xlu1 %v540_v35  ;;  %553 = vadd.xlane.f32.xlu0 %v541_v39  ;;  %v2856_v42 = vsub.f32 %v2820_v7, %v528_v40  ;;  %v1023_v35 = vld [vmem:[%s2883_s28] sm:$0xff] }
  0xf1   : > { %v2890_v40 = vld [vmem:[%s3405_s2] ss:$0 sm:$0xff] }
  0xf2   : > { %v543_v44 = vmul.f32 %v2853_v41, %v2853_v41  ;;  %v544_v45 = vmul.f32 %v2856_v42, %v2856_v42 }
  0xf4   : > { %555 = vadd.xlane.f32.xlu1 %v542_v43  ;;  %557 = vadd.xlane.f32.xlu0 %v543_v44 }
  0xf8   : > { %559 = vadd.xlane.f32.xlu1 %v544_v45  ;;  %v1056_v45 = vsel %vm1055_vm0, %v1023_v35, 0.0 }
  0xf9   : > { %v1058_v55 = vadd.f32 %v1057_v46, %v1056_v45 }
 0x175   : > { %v546_v12 = vpop.xlane.xlu0 %545 }
 0x176   : > { %v561_v13 = vmul.f32 0.0078125, %v546_v12  ;;  %v2921_v12 = vpack.c.bf16 %v2814_v5, %v2812_v4  ;;  %v1071_v4 = vsel %vm1055_vm0, %v1033_v62, 0.0  ;;  %v1026_v5 = vld [vmem:[%s2883_s28 + $0x18] sm:$0xff] }
 0x177   : > { %v1077_v35 = vsel %vm1055_vm0, %v1026_v5, 0.0  ;;  %v1051_v5 = vld [vmem:[%s2883_s28 + $0xe0] sm:$0xff] }
 0x178   : > { %v569_v14 = vadd.f32 1e-12, %v561_v13  ;;  %v2925_v13 = vpack.c.bf16 %v2820_v7, %v2818_v6 }
 0x179   : > { %v548_v0 = vpop.xlane.xlu1 %547  ;;  %v550_v2 = vpop.xlane.xlu0 %549 }
 0x17a   : > { %2434 = vrsqrt.f32 %v569_v14  ;;  %v562_v15 = vmul.f32 0.0078125, %v548_v0  ;;  %v563_v16 = vmul.f32 0.0078125, %v550_v2  ;;  %v1065_v2 = vadd.f32 %v1064_v60, %v1063_v59 }
 0x17c   : > { %v570_v17 = vadd.f32 1e-12, %v562_v15  ;;  %v571_v20 = vadd.f32 1e-12, %v563_v16  ;;  %v1070_v15 = vsel %vm1055_vm0, %v1025_v61, 0.0  ;;  %v1034_v16 = vld [vmem:[%s2883_s28 + $0x58] sm:$0xff] }
 0x17d   : > { %v552_v21 = vpop.xlane.xlu1 %551  ;;  %v554_v22 = vpop.xlane.xlu0 %553  ;;  %v1078_v36 = vsel %vm1055_vm0, %v1034_v16, 0.0  ;;  %v1045_v16 = vld [vmem:[%s2883_s28 + $0xb0] sm:$0xff] }
 0x17e   : > { %2436 = vrsqrt.f32 %v570_v17  ;;  %v564_v23 = vmul.f32 0.0078125, %v552_v21  ;;  %v565_v24 = vmul.f32 0.0078125, %v554_v22  ;;  %v1066_v21 = vsel %vm1055_vm0, %v1040_v11, 0.0  ;;  %v1049_v22 = vld [vmem:[%s2883_s28 + $0xd0] sm:$0xff] }
 0x17f   : > { %2438 = vrsqrt.f32 %v571_v20  ;;  %v1060_v20 = vadd.f32 %v1059_v10, %v1058_v55  ;;  %v1067_v50 = vadd.f32 %v1066_v21, %v1065_v2  ;;  %v1092_v10 = vsel %vm1055_vm0, %v1036_v52, 0.0  ;;  %v825_v52 = vld [vmem:[%s3409_s6 + $0x10] sm:$0xff] }
 0x180   : > { %v572_v27 = vadd.f32 1e-12, %v564_v23  ;;  %v573_v28 = vadd.f32 1e-12, %v565_v24  ;;  %v1027_v23 = vld [vmem:[%s2883_s28 + $0x20] sm:$0xff] }
 0x181   : > { %v556_v29 = vpop.xlane.xlu1 %555  ;;  %v558_v30 = vpop.xlane.xlu0 %557  ;;  %v1035_v24 = vld [vmem:[%s2883_s28 + $0x60] sm:$0xff] }
 0x182   : > { %2440 = vrsqrt.f32 %v572_v27  ;;  %v566_v31 = vmul.f32 0.0078125, %v556_v29  ;;  %v567_v32 = vmul.f32 0.0078125, %v558_v30  ;;  %v1068_v29 = vsel %vm1055_vm0, %v1048_v1, 0.0 }
 0x183   : > { %2442 = vrsqrt.f32 %v573_v28  ;;  %v1073_v30 = vsel %vm1055_vm0, %v1041_v3, 0.0 }
 0x184   : > { %v2435_v37 = vpop.eup %2434  ;;  %v574_v38 = vadd.f32 1e-12, %v566_v31  ;;  %v575_v39 = vadd.f32 1e-12, %v567_v32  ;;  %v1072_v32 = vadd.f32 %v1071_v4, %v1070_v15  ;;  %v1069_v15 = vadd.f32 %v1068_v29, %v1067_v50  ;;  %v1046_v29 = vld [vmem:[%s2883_s28 + $0xb8] sm:$0xff] }
 0x185   : > { %v560_v43 = vpop.xlane.xlu1 %559  ;;  %v585_v44 = vmul.f32 %v2435_v37, %v2825_v18 }
 0x186   : > { %2444 = vrsqrt.f32 %v574_v38  ;;  %v568_v47 = vmul.f32 0.0078125, %v560_v43  ;;  %v1075_v38 = vsel %vm1055_vm0, %v1049_v22, 0.0  ;;  %v1084_v43 = vsel %vm1055_vm0, %v1027_v23, 0.0 }
 0x187   : > { %2446 = vrsqrt.f32 %v575_v39  ;;  %v600_v51 = vmul.f32 %v2890_v40, %v585_v44  ;;  %v1050_v39 = vld [vmem:[%s2883_s28 + $0xd8] sm:$0xff]  ;;  %v1085_v44 = vsel %vm1055_vm0, %v1035_v24, 0.0 }
 0x188   : > { %v2437_v18 = vpop.eup %2436  ;;  %v576_v53 = vadd.f32 1e-12, %v568_v47  ;;  %v1082_v59 = vsel %vm1055_vm0, %v1050_v39, 0.0  ;;  %v1086_v60 = vadd.f32 %v1085_v44, %v1084_v43  ;;  %v1054_v39 = vld [vmem:[%s2883_s28 + $0xf8] sm:$0xff] }
 0x189   : > { %v2439_v56 = vpop.eup %2438  ;;  %v615_v57 = vadd.f32 %v2898_v48, %v600_v51  ;;  %v586_v58 = vmul.f32 %v2437_v18, %v2833_v25  ;;  %v1043_v51 = vld [vmem:[%s2883_s28 + $0xa0] sm:$0xff] }
 0x18a   : > { %2448 = vrsqrt.f32 %v576_v53  ;;  %v587_v63 = vmul.f32 %v2439_v56, %v2828_v19  ;;  %v1061_v19 = vsel %vm1055_vm0, %v1047_v54, 0.0  ;;  %v1079_v54 = vadd.f32 %v1078_v36, %v1077_v35  ;;  %v1029_v56 = vld [vmem:[%s2883_s28 + $0x30] sm:$0xff] }
 0x18b   : > { %2038 = vmatprep.mubr.f32.mxu0 %v615_v57  ;;  %v601_v25 = vmul.f32 %v2890_v40, %v586_v58  ;;  %v1062_v49 = vadd.f32 %v1061_v19, %v1060_v20  ;;  %v1037_v57 = vld [vmem:[%s2883_s28 + $0x70] sm:$0xff]  ;;  %v1074_v58 = vadd.f32 %v1073_v30, %v1072_v32  ;;  %v1044_v19 = vld [vmem:[%s2883_s28 + $0xa8] sm:$0xff]  ;;  %v1098_v1 = vsel %vm1055_vm0, %v1029_v56, 0.0 }
 0x18c   : > { %v2441_v14 = vpop.eup %2440  ;;  %v602_v0 = vmul.f32 %v2890_v40, %v587_v63  ;;  %v1099_v3 = vsel %vm1055_vm0, %v1037_v57, 0.0  ;;  %v1094_v20 = vsel %vm1055_vm0, %v1044_v19, 0.0  ;;  %v1114_v30 = vmul.f32 0.25, %v1069_v15  ;;  %v829_v57 = vld [vmem:[%s3409_s6 + $0x30] sm:$0xff] }
 0x18d   : > { %v2443_v6 = vpop.eup %2442  ;;  %v616_v7 = vadd.f32 %v2898_v48, %v601_v25  ;;  %v588_v17 = vmul.f32 %v2441_v14, %v2836_v26  ;;  %v1042_v26 = vld [vmem:[%s2883_s28 + $0x98] sm:$0xff]  ;;  %v1113_v2 = vmul.f32 0.25, %v1062_v49  ;;  %v1100_v21 = vadd.f32 %v1099_v3, %v1098_v1 }
 0x18e   : > { %v617_v27 = vadd.f32 %v2898_v48, %v602_v0  ;;  %v589_v28 = vmul.f32 %v2443_v6, %v2843_v33  ;;  %v1080_v55 = vsel %vm1055_vm0, %v1042_v26, 0.0  ;;  %v1038_v14 = vld [vmem:[%s2883_s28 + $0x78] sm:$0xff]  ;;  %v1076_v6 = vadd.f32 %v1075_v38, %v1074_v58 }
 0x18f   : > { %2039 = vmatmul.mubr.f32.vlgmr.msra.gmra.mrb[0].mxu0 %v616_v7  ;;  %v603_v31 = vmul.f32 %v2890_v40, %v588_v17  ;;  %v1081_v4 = vadd.f32 %v1080_v55, %v1079_v54  ;;  %v1106_v23 = vsel %vm1055_vm0, %v1038_v14, 0.0  ;;  %v827_v54 = vld [vmem:[%s3409_s6 + $0x20] sm:$0xff]  ;;  %v828_v55 = vld [vmem:[%s3409_s6 + $0x28] sm:$0xff]  ;;  %v838_v1 = vld [vmem:[%s3409_s6 + $0x78] sm:$0xff] }
 0x190   : > { %v2445_v37 = vpop.eup %2444  ;;  %2041 = vmatprep.mubr.f32.mxu0 %v617_v27  ;;  %v604_v33 = vmul.f32 %v2890_v40, %v589_v28  ;;  %2289 = vmatpush3.bf16.msra.mxu0 %v2866_v8  ;;  %v1028_v8 = vld [vmem:[%s2883_s28 + $0x28] sm:$0xff]  ;;  %v1101_v28 = vsel %vm1055_vm0, %v1045_v16, 0.0  ;;  %v2262_v56 = vpack.c.bf16 %v828_v55, %v827_v54 }
 0x191   : > { %v2447_v45 = vpop.eup %2446  ;;  %v618_v46 = vadd.f32 %v2898_v48, %v603_v31  ;;  %v590_v47 = vmul.f32 %v2445_v37, %v2846_v34  ;;  %2291 = vmatprep.subr.bf16.mxu0 %v2914_v9  ;;  %v1091_v63 = vsel %vm1055_vm0, %v1028_v8, 0.0  ;;  %v1052_v27 = vld [vmem:[%s2883_s28 + $0xe8] sm:$0xff]  ;;  %v1115_v31 = vmul.f32 0.25, %v1076_v6 }
 0x192   : > { %v619_v18 = vadd.f32 %v2898_v48, %v604_v33  ;;  %v591_v53 = vmul.f32 %v2447_v45, %v2853_v41  ;;  %v1087_v41 = vsel %vm1055_vm0, %v1043_v51, 0.0  ;;  %v1093_v17 = vadd.f32 %v1092_v10, %v1091_v63  ;;  %v835_v10 = vld [vmem:[%s3409_s6 + $0x60] sm:$0xff]  ;;  %v1251_v14 = vld [vmem:[%s3411_s8 + $0x8] sm:$0xff] }
 0x193   : > { %2042 = vmatmul.mubr.f32.gmra.mrb[2].mxu0 %v618_v46  ;;  %v605_v34 = vmul.f32 %v2890_v40, %v590_v47  ;;  %v1088_v7 = vadd.f32 %v1087_v41, %v1086_v60  ;;  %v1083_v32 = vadd.f32 %v1082_v59, %v1081_v4  ;;  %v1096_v36 = vsel %vm1055_vm0, %v1052_v27, 0.0  ;;  %v831_v59 = vld [vmem:[%s3409_s6 + $0x40] sm:$0xff]  ;;  %v832_v60 = vld [vmem:[%s3409_s6 + $0x48] sm:$0xff]  ;;  %v834_v41 = vld [vmem:[%s3409_s6 + $0x58] sm:$0xff] }
 0x194   : > { %v2449_v61 = vpop.eup %2448  ;;  %2044 = vmatprep.mubr.f32.mxu0 %v619_v18  ;;  %v606_v62 = vmul.f32 %v2890_v40, %v591_v53  ;;  %2293 = vmatpush3.bf16.msra.mxu0 %v2914_v9  ;;  %v1030_v9 = vld [vmem:[%s2883_s28 + $0x38] sm:$0xff]  ;;  %v1095_v26 = vadd.f32 %v1094_v20, %v1093_v17  ;;  %v1102_v37 = vadd.f32 %v1101_v28, %v1100_v21  ;;  %v1108_v33 = vsel %vm1055_vm0, %v1046_v29, 0.0 }
 0x195   : > { %v620_v11 = vadd.f32 %v2898_v48, %v605_v34  ;;  %v592_v25 = vmul.f32 %v2449_v61, %v2856_v42  ;;  %2295 = vmatprep.subr.bf16.mxu0 %v2921_v12  ;;  %v1105_v22 = vsel %vm1055_vm0, %v1030_v9, 0.0  ;;  %v1116_v43 = vmul.f32 0.25, %v1083_v32  ;;  %v826_v18 = vld [vmem:[%s3409_s6 + $0x18] sm:$0xff]  ;;  %v1250_v9 = vld [vmem:[%s3411_s8] sm:$0xff] }
 0x196   : > { %v621_v0 = vadd.f32 %v2898_v48, %v606_v62  ;;  %v1107_v35 = vadd.f32 %v1106_v23, %v1105_v22  ;;  %v1097_v44 = vadd.f32 %v1096_v36, %v1095_v26  ;;  %v1110_v47 = vsel %vm1055_vm0, %v1054_v39, 0.0  ;;  %v830_v34 = vld [vmem:[%s3409_s6 + $0x38] sm:$0xff]  ;;  %v833_v62 = vld [vmem:[%s3409_s6 + $0x50] sm:$0xff] }
 0x197   : > { %2045 = vmatmul.mubr.f32.gmra.mrb[4].mxu0 %v620_v11  ;;  %v607_v42 = vmul.f32 %v2890_v40, %v592_v25  ;;  %v1089_v40 = vsel %vm1055_vm0, %v1051_v5, 0.0  ;;  %v2258_v53 = vpack.c.bf16 %v826_v18, %v825_v52  ;;  %v2266_v58 = vpack.c.bf16 %v830_v34, %v829_v57  ;;  %v836_v11 = vld [vmem:[%s3409_s6 + $0x68] sm:$0xff]  ;;  %v837_v25 = vld [vmem:[%s3409_s6 + $0x70] sm:$0xff] }
 0x198   : > { %2047 = vmatprep.mubr.f32.mxu0 %v621_v0  ;;  %2297 = vmatpush3.bf16.msra.mxu0 %v2921_v12  ;;  %v1053_v12 = vld [vmem:[%s2883_s28 + $0xf0] sm:$0xff]  ;;  %v1109_v45 = vadd.f32 %v1108_v33, %v1107_v35  ;;  %v1118_v49 = vmul.f32 0.25, %v1097_v44  ;;  %v2270_v61 = vpack.c.bf16 %v832_v60, %v831_v59  ;;  %v2274_v63 = vpack.c.bf16 %v834_v41, %v833_v62 }
 0x199   : > { %v622_v24 = vadd.f32 %v2898_v48, %v607_v42  ;;  %2299 = vmatprep.subr.bf16.mxu0 %v2925_v13  ;;  %v1090_v48 = vadd.f32 %v1089_v40, %v1088_v7  ;;  %v1103_v38 = vsel %vm1055_vm0, %v1053_v12, 0.0  ;;  %2259 = vmatprep.subr.bf16.mxu1 %v2258_v53  ;;  %v2278_v19 = vpack.c.bf16 %v836_v11, %v835_v10 }
 0x19a   : > { %v1111_v50 = vadd.f32 %v1110_v47, %v1109_v45  ;;  %2261 = vmatpush3.bf16.msra.mxu1 %v2258_v53  ;;  %v2282_v3 = vpack.c.bf16 %v838_v1, %v837_v25  ;;  %v3058_v0 = vpack.c.bf16 %v1251_v14, %v1250_v9 }
 0x19b   : > { %2048 = vmatmul.mubr.f32.gmra.mrb[6].mxu0 %v622_v24  ;;  %v1117_v46 = vmul.f32 0.25, %v1090_v48  ;;  %2263 = vmatprep.subr.bf16.mxu1 %v2262_v56 }
 0x19c   : > { %2301 = vmatpush3.bf16.msra.mxu0 %v2925_v13  ;;  %2110 = vmatprep.mubr.msk.f32.mxu0 %vm1055_vm0, %v1113_v2  ;;  %v1104_v13 = vadd.f32 %v1103_v38, %v1102_v37  ;;  %v1120_v8 = vmul.f32 0.25, %v1111_v50  ;;  %v1853_v2 = vld [vmem:[%s3408_s5] ss:$0 sm:$0xff] }
 0x19e   : > { %v1119_v51 = vmul.f32 0.25, %v1104_v13  ;;  %2265 = vmatpush3.bf16.msra.mxu1 %v2262_v56 }
 0x19f   : > { %2111 = vmatmul.mubr.msk.f32.vlgmr.msra.gmra.mrb[8].mxu0 %vm1055_vm0, %v1114_v30  ;;  %2267 = vmatprep.subr.bf16.mxu1 %v2266_v58 }
 0x1a0   : > { %2113 = vmatprep.mubr.msk.f32.mxu0 %vm1055_vm0, %v1115_v31 }
 0x1a2   : > { %2269 = vmatpush3.bf16.msra.mxu1 %v2266_v58 }
 0x1a3   : > { %2114 = vmatmul.mubr.msk.f32.gmra.mrb[10].mxu0 %vm1055_vm0, %v1116_v43  ;;  %2271 = vmatprep.subr.bf16.mxu1 %v2270_v61 }
 0x1a4   : > { %2116 = vmatprep.mubr.msk.f32.mxu0 %vm1055_vm0, %v1117_v46 }
 0x1a6   : > { %2273 = vmatpush3.bf16.msra.mxu1 %v2270_v61 }
 0x1a7   : > { %2117 = vmatmul.mubr.msk.f32.gmra.mrb[12].mxu0 %vm1055_vm0, %v1118_v49  ;;  %2275 = vmatprep.subr.bf16.mxu1 %v2274_v63 }
 0x1a8   : > { %2119 = vmatprep.mubr.msk.f32.mxu0 %vm1055_vm0, %v1119_v51 }
 0x1aa   : > { %2277 = vmatpush3.bf16.msra.mxu1 %v2274_v63 }
 0x1ab   : > { %2120 = vmatmul.mubr.msk.f32.gmra.mrb[14].mxu0 %vm1055_vm0, %v1120_v8  ;;  %2279 = vmatprep.subr.bf16.mxu1 %v2278_v19 }
 0x1ae   : > { %2281 = vmatpush3.bf16.msra.mxu1 %v2278_v19 }
 0x1af   : > { %2283 = vmatprep.subr.bf16.mxu1 %v2282_v3 }
 0x1b2   : > { %2285 = vmatpush3.bf16.msra.mxu1 %v2282_v3 }
 0x1b3   : > { %2303 = vmatprep.subr.bf16.mxu1 %v3058_v0 }
 0x262   : > { %v2040_v15 = vpop.f32.mrb[0].mxu0 }
 0x263   : > { %v3064_v4 = vadd.f32 %v2040_v15, %v1853_v2  ;;  %v712_v5 = vpop.f32.mrb[1].mxu0 }
 0x264   : > { %v3066_v16 = vadd.f32 %v1853_v2, %v712_v5 }
 0x265   : > { %v760_v42 = vmul.f32 0.044715, %v3064_v4 }
 0x266   : > { %v2043_v6 = vpop.f32.mrb[2].mxu0  ;;  %v759_v7 = vmul.f32 0.044715, %v3066_v16  ;;  %v751_v5 = vmul.f32 0.5, %v3066_v16 }
 0x267   : > { %v768_v17 = vmul.f32 %v760_v42, %v3064_v4  ;;  %v3071_v20 = vadd.f32 %v2043_v6, %v1853_v2  ;;  %v722_v21 = vpop.f32.mrb[3].mxu0  ;;  %v1252_v6 = vld [vmem:[%s3411_s8 + $0x10] sm:$0xff] }
 0x268   : > { %v3073_v22 = vadd.f32 %v1853_v2, %v722_v21  ;;  %v767_v23 = vmul.f32 %v759_v7, %v3066_v16  ;;  %v1253_v7 = vld [vmem:[%s3411_s8 + $0x18] sm:$0xff]  ;;  %v752_v21 = vmul.f32 0.5, %v3064_v4 }
 0x269   : > { %v762_v24 = vmul.f32 0.044715, %v3071_v20  ;;  %v776_v40 = vmul.f32 %v768_v17, %v3064_v4 }
 0x26a   : > { %v761_v27 = vmul.f32 0.044715, %v3073_v22  ;;  %v2046_v28 = vpop.f32.mrb[4].mxu0  ;;  %v775_v29 = vmul.f32 %v767_v23, %v3066_v16 }
 0x26b   : > { %v770_v30 = vmul.f32 %v762_v24, %v3071_v20  ;;  %v3081_v12 = vadd.f32 %v2046_v28, %v1853_v2  ;;  %v732_v31 = vpop.f32.mrb[5].mxu0  ;;  %v784_v32 = vadd.f32 %v776_v40, %v3064_v4  ;;  %v1255_v4 = vld [vmem:[%s3411_s8 + $0x28] sm:$0xff] }
 0x26c   : > { %v769_v26 = vmul.f32 %v761_v27, %v3073_v22  ;;  %v3085_v35 = vadd.f32 %v1853_v2, %v732_v31  ;;  %v783_v48 = vadd.f32 %v775_v29, %v3066_v16  ;;  %v2306_v16 = vpack.c.bf16 %v1253_v7, %v1252_v6  ;;  %v1459_v6 = vld [vmem:[%s3414_s11 + $0x8] sm:$0xff] }
 0x26d   : > { %v764_v36 = vmul.f32 0.044715, %v3081_v12  ;;  %v792_v37 = vmul.f32 0.7978846, %v784_v32  ;;  %v778_v33 = vmul.f32 %v770_v30, %v3071_v20  ;;  %v753_v30 = vmul.f32 0.5, %v3073_v22  ;;  %v1254_v32 = vld [vmem:[%s3411_s8 + $0x20] sm:$0xff] }
 0x26e   : > { %v763_v38 = vmul.f32 0.044715, %v3085_v35  ;;  %v2049_v39 = vpop.f32.mrb[6].mxu0  ;;  %v791_v43 = vmul.f32 0.7978846, %v783_v48  ;;  %v777_v44 = vmul.f32 %v769_v26, %v3073_v22  ;;  %v754_v48 = vmul.f32 0.5, %v3071_v20 }
 0x26f   : > { %v772_v45 = vmul.f32 %v764_v36, %v3081_v12  ;;  %v3093_v46 = vadd.f32 %v2049_v39, %v1853_v2  ;;  %v742_v13 = vpop.f32.mrb[7].mxu0  ;;  %2450 = vtanh.f32 %v792_v37  ;;  %v786_v47 = vadd.f32 %v778_v33, %v3071_v20  ;;  %v1257_v20 = vld [vmem:[%s3411_s8 + $0x38] sm:$0xff] }
 0x270   : > { %v771_v49 = vmul.f32 %v763_v38, %v3085_v35  ;;  %v3097_v50 = vadd.f32 %v1853_v2, %v742_v13  ;;  %2452 = vtanh.f32 %v791_v43  ;;  %v785_v51 = vadd.f32 %v777_v44, %v3073_v22 }
 0x271   : > { %v766_v8 = vmul.f32 0.044715, %v3093_v46  ;;  %v794_v52 = vmul.f32 0.7978846, %v786_v47  ;;  %v780_v18 = vmul.f32 %v772_v45, %v3081_v12  ;;  %v2310_v38 = vpack.c.bf16 %v1255_v4, %v1254_v32  ;;  %v1256_v45 = vld [vmem:[%s3411_s8 + $0x30] sm:$0xff] }
 0x272   : > { %v765_v53 = vmul.f32 0.044715, %v3097_v50  ;;  %v793_v54 = vmul.f32 0.7978846, %v785_v51  ;;  %v779_v55 = vmul.f32 %v771_v49, %v3085_v35  ;;  %v3104_v56 = vpop.f32.mrb[8].mxu0  ;;  %v755_v43 = vmul.f32 0.5, %v3085_v35 }
 0x273   : > { %v774_v57 = vmul.f32 %v766_v8, %v3093_v46  ;;  %2454 = vtanh.f32 %v794_v52  ;;  %v788_v34 = vadd.f32 %v780_v18, %v3081_v12  ;;  %v3108_v58 = vpop.f32.mrb[9].mxu0  ;;  %v2314_v8 = vpack.c.bf16 %v1257_v20, %v1256_v45 }
 0x274   : > { %v773_v59 = vmul.f32 %v765_v53, %v3097_v50  ;;  %2456 = vtanh.f32 %v793_v54  ;;  %v787_v60 = vadd.f32 %v779_v55, %v3085_v35  ;;  %v757_v52 = vmul.f32 0.5, %v3097_v50  ;;  %v1258_v53 = vld [vmem:[%s3411_s8 + $0x40] sm:$0xff] }
 0x275   : > { %v796_v61 = vmul.f32 0.7978846, %v788_v34  ;;  %v782_v62 = vmul.f32 %v774_v57, %v3093_v46  ;;  %v758_v54 = vmul.f32 0.5, %v3093_v46 }
 0x276   : > { %v795_v41 = vmul.f32 0.7978846, %v787_v60  ;;  %v781_v63 = vmul.f32 %v773_v59, %v3097_v50  ;;  %v3114_v10 = vpop.f32.mrb[10].mxu0  ;;  %v1261_v59 = vld [vmem:[%s3411_s8 + $0x58] sm:$0xff]  ;;  %v1262_v60 = vld [vmem:[%s3411_s8 + $0x60] sm:$0xff] }
 0x277   : > { %2458 = vtanh.f32 %v796_v61  ;;  %v790_v11 = vadd.f32 %v782_v62, %v3093_v46  ;;  %v3117_v25 = vpop.f32.mrb[11].mxu0  ;;  %v1263_v61 = vld [vmem:[%s3411_s8 + $0x68] sm:$0xff] }
 0x278   : > { %2460 = vtanh.f32 %v795_v41  ;;  %v789_v19 = vadd.f32 %v781_v63, %v3097_v50  ;;  %v1260_v50 = vld [vmem:[%s3411_s8 + $0x50] sm:$0xff]  ;;  %v2326_v62 = vpack.c.bf16 %v1263_v61, %v1262_v60  ;;  %v3262_v61 = vld [vmem:[%s3434_s25] ss:$0 sm:$0xff] }
 0x279   : > { %v2451_v1 = vpop.eup %2450  ;;  %v798_v3 = vmul.f32 0.7978846, %v790_v11  ;;  %v2322_v46 = vpack.c.bf16 %v1261_v59, %v1260_v50  ;;  %v1264_v41 = vld [vmem:[%s3411_s8 + $0x70] sm:$0xff]  ;;  %v1450_v11 = vld [vmem:[%s3413_s10] sm:$0xff] }
 0x27a   : > { %v2453_v9 = vpop.eup %2452  ;;  %v808_v14 = vadd.f32 1.0, %v2451_v1  ;;  %v797_v2 = vmul.f32 0.7978846, %v789_v19  ;;  %v3120_v15 = vpop.f32.mrb[12].mxu0 }
 0x27b   : > { %v807_v42 = vadd.f32 1.0, %v2453_v9  ;;  %2462 = vtanh.f32 %v798_v3  ;;  %v3129_v17 = vpop.f32.mrb[13].mxu0  ;;  %v1454_v3 = vld [vmem:[%s3413_s10 + $0x20] sm:$0xff]  ;;  %v1455_v9 = vld [vmem:[%s3413_s10 + $0x28] sm:$0xff] }
 0x27c   : > { %2464 = vtanh.f32 %v797_v2  ;;  %v816_v27 = vmul.f32 %v808_v14, %v752_v21  ;;  %v3213_v14 = vpack.c.bf16 %v1455_v9, %v1454_v3  ;;  %v1456_v2 = vld [vmem:[%s3413_s10 + $0x30] sm:$0xff]  ;;  %v1461_v21 = vld [vmem:[%s3414_s11 + $0x18] sm:$0xff] }
 0x27d   : > { %v2455_v23 = vpop.eup %2454  ;;  %v815_v24 = vmul.f32 %v807_v42, %v751_v5  ;;  %v1458_v42 = vld [vmem:[%s3414_s11] sm:$0xff] }
 0x27e   : > { %v2457_v40 = vpop.eup %2456  ;;  %v810_v28 = vadd.f32 1.0, %v2455_v23  ;;  %v3132_v29 = vpop.f32.mrb[14].mxu0  ;;  %v2334_v7 = vpack.c.bf16 %v1459_v6, %v1458_v42 }
 0x27f   : > { %2082 = vmatprep.mubr.f32.mxu1 %v815_v24  ;;  %v809_v31 = vadd.f32 1.0, %v2457_v40  ;;  %v3141_v26 = vpop.f32.mrb[15].mxu0  ;;  %v1462_v24 = vld [vmem:[%s3414_s11 + $0x20] sm:$0xff]  ;;  %v1463_v40 = vld [vmem:[%s3414_s11 + $0x28] sm:$0xff] }
 0x280   : > { %2083 = vmatmul.mubr.f32.vlgmr.msra.gmra.mrb[0].mxu1 %v816_v27  ;;  %v818_v22 = vmul.f32 %v810_v28, %v754_v48  ;;  %2335 = vmatprep.subr.bf16.mxu0 %v2334_v7  ;;  %v2342_v27 = vpack.c.bf16 %v1463_v40, %v1462_v24  ;;  %v1465_v28 = vld [vmem:[%s3414_s11 + $0x38] sm:$0xff] }
 0x281   : > { %v2459_v36 = vpop.eup %2458  ;;  %2305 = vmatpush3.bf16.msra.mxu1 %v3058_v0  ;;  %v817_v37 = vmul.f32 %v809_v31, %v753_v30  ;;  %v756_v0 = vmul.f32 0.5, %v3081_v12  ;;  %v1259_v12 = vld [vmem:[%s3411_s8 + $0x48] sm:$0xff]  ;;  %2337 = vmatpush3.bf16.msra.mxu0 %v2334_v7 }
 0x282   : > { %v2461_v33 = vpop.eup %2460  ;;  %2307 = vmatprep.subr.bf16.mxu1 %v2306_v16  ;;  %v812_v39 = vadd.f32 1.0, %v2459_v36  ;;  %v2318_v34 = vpack.c.bf16 %v1259_v12, %v1258_v53 }
 0x283   : > { %2085 = vmatprep.mubr.f32.mxu1 %v817_v37  ;;  %v811_v44 = vadd.f32 1.0, %v2461_v33 }
 0x284   : > { %2086 = vmatmul.mubr.f32.gmra.mrb[2].mxu1 %v818_v22  ;;  %v820_v51 = vmul.f32 %v812_v39, %v756_v0 }
 0x285   : > { %v2463_v13 = vpop.eup %2462  ;;  %2309 = vmatpush3.bf16.msra.mxu1 %v2306_v16  ;;  %v819_v47 = vmul.f32 %v811_v44, %v755_v43  ;;  %v1464_v16 = vld [vmem:[%s3414_s11 + $0x30] sm:$0xff] }
 0x286   : > { %v2465_v49 = vpop.eup %2464  ;;  %2311 = vmatprep.subr.bf16.mxu1 %v2310_v38  ;;  %v814_v35 = vadd.f32 1.0, %v2463_v13 }
 0x287   : > { %2088 = vmatprep.mubr.f32.mxu1 %v819_v47  ;;  %v813_v18 = vadd.f32 1.0, %v2465_v49 }
 0x288   : > { %2089 = vmatmul.mubr.f32.gmra.mrb[4].mxu1 %v820_v51  ;;  %v822_v57 = vmul.f32 %v814_v35, %v758_v54 }
 0x289   : > { %2313 = vmatpush3.bf16.msra.mxu1 %v2310_v38  ;;  %v821_v55 = vmul.f32 %v813_v18, %v757_v52 }
 0x28a   : > { %2315 = vmatprep.subr.bf16.mxu1 %v2314_v8 }
 0x28b   : > { %2091 = vmatprep.mubr.f32.mxu1 %v821_v55 }
 0x28c   : > { %2092 = vmatmul.mubr.f32.gmra.mrb[6].mxu1 %v822_v57 }
 0x28d   : > { %2317 = vmatpush3.bf16.msra.mxu1 %v2314_v8  ;;  %2154 = vmatprep.mubr.f32.mxu1 %v3108_v58  ;;  %v1265_v58 = vld [vmem:[%s3411_s8 + $0x78] sm:$0xff] }
 0x28e   : > { %2319 = vmatprep.subr.bf16.mxu1 %v2318_v34  ;;  %v2330_v63 = vpack.c.bf16 %v1265_v58, %v1264_v41 }
 0x291   : > { %2321 = vmatpush3.bf16.msra.mxu1 %v2318_v34 }
 0x292   : > { %2323 = vmatprep.subr.bf16.mxu1 %v2322_v46 }
 0x295   : > { %2325 = vmatpush3.bf16.msra.mxu1 %v2322_v46 }
 0x296   : > { %2327 = vmatprep.subr.bf16.mxu1 %v2326_v62 }
 0x299   : > { %2329 = vmatpush3.bf16.msra.mxu1 %v2326_v62 }
 0x29a   : > { %2331 = vmatprep.subr.bf16.mxu1 %v2330_v63 }
 0x29d   : > { %2333 = vmatpush3.bf16.msra.mxu1 %v2330_v63 }
 0x2a0   : > { %2155 = vmatmul.mubr.f32.vlgmr.msra.gmra.mrb[8].mxu1 %v3104_v56  ;;  %v1451_v56 = vld [vmem:[%s3413_s10 + $0x8] sm:$0xff] }
 0x2a1   : > { %2157 = vmatprep.mubr.f32.mxu1 %v3117_v25  ;;  %v3193_v19 = vpack.c.bf16 %v1451_v56, %v1450_v11  ;;  %v1453_v25 = vld [vmem:[%s3413_s10 + $0x18] sm:$0xff] }
 0x2a3   : > { %2366 = vmatprep.subr.bf16.mxu1 %v3193_v19 }
 0x2a4   : > { %2158 = vmatmul.mubr.f32.gmra.mrb[10].mxu1 %v3114_v10  ;;  %v1452_v10 = vld [vmem:[%s3413_s10 + $0x10] sm:$0xff] }
 0x2a5   : > { %2160 = vmatprep.mubr.f32.mxu1 %v3129_v17  ;;  %2370 = vmatpush3.bf16.msra.mxu1 %v3193_v19  ;;  %v3203_v1 = vpack.c.bf16 %v1453_v25, %v1452_v10  ;;  %v1460_v17 = vld [vmem:[%s3414_s11 + $0x10] sm:$0xff] }
 0x2a6   : > { %v2338_v23 = vpack.c.bf16 %v1461_v21, %v1460_v17 }
 0x2a7   : > { %2367 = vmatprep.subr.bf16.mxu1 %v3203_v1 }
 0x2a8   : > { %2161 = vmatmul.mubr.f32.gmra.mrb[12].mxu1 %v3120_v15  ;;  %v1457_v15 = vld [vmem:[%s3413_s10 + $0x38] sm:$0xff]  ;;  %2339 = vmatprep.subr.bf16.mxu0 %v2338_v23 }
 0x2a9   : > { %2163 = vmatprep.mubr.f32.mxu1 %v3141_v26  ;;  %2371 = vmatpush3.bf16.msra.mxu1 %v3203_v1  ;;  %v3223_v5 = vpack.c.bf16 %v1457_v15, %v1456_v2  ;;  %v1854_v26 = vld [vmem:[%s3410_s7] ss:$0 sm:$0xff] }
 0x2aa   : > { %2368 = vmatprep.subr.bf16.mxu1 %v3213_v14  ;;  %2341 = vmatpush3.bf16.msra.mxu0 %v2338_v23 }
 0x2ab   : > { %2343 = vmatprep.subr.bf16.mxu0 %v2342_v27 }
 0x2ac   : > { %2164 = vmatmul.mubr.f32.gmra.mrb[14].mxu1 %v3132_v29  ;;  %v2346_v29 = vpack.c.bf16 %v1465_v28, %v1464_v16 }
 0x2ad   : > { %2372 = vmatpush3.bf16.msra.mxu1 %v3213_v14 }
 0x2ae   : > { %2369 = vmatprep.subr.bf16.mxu1 %v3223_v5  ;;  %2345 = vmatpush3.bf16.msra.mxu0 %v2342_v27 }
 0x2af   : > { %2347 = vmatprep.subr.bf16.mxu0 %v2346_v29 }
 0x2b1   : > { %2373 = vmatpush3.bf16.msra.mxu1 %v3223_v5 }
 0x2b2   : > { %2349 = vmatpush3.bf16.msra.mxu0 %v2346_v29 }
 0x2b3   : > { %2351 = vmatprep.subr.bf16.mxu0 %v3193_v19 }
 0x353   : > { %v2084_v30 = vpop.f32.mrb[0].mxu1 }
 0x354   : > { %v912_v31 = vpop.f32.mrb[1].mxu1  ;;  %v3255_v46 = vadd.f32 %v2084_v30, %v1854_v26 }
 0x355   : > { %v3257_v60 = vadd.f32 %v1854_v26, %v912_v31 }
 0x356   : > { %v960_v41 = vmul.f32 0.044715, %v3255_v46 }
 0x357   : > { %v2087_v32 = vpop.f32.mrb[2].mxu1  ;;  %v959_v9 = vmul.f32 0.044715, %v3257_v60 }
 0x358   : > { %v922_v4 = vpop.f32.mrb[3].mxu1  ;;  %v968_v6 = vmul.f32 %v960_v41, %v3255_v46  ;;  %v3273_v7 = vadd.f32 %v2087_v32, %v1854_v26 }
 0x359   : > { %v3276_v24 = vadd.f32 %v1854_v26, %v922_v4 }
 0x35b   : > { %v2090_v48 = vpop.f32.mrb[4].mxu1 }
 0x35c   : > { %v938_v36 = vadd.f32 %v2090_v48, %v1854_v26  ;;  %v932_v37 = vpop.f32.mrb[5].mxu1 }
 0x35d   : > { %v933_v33 = vadd.f32 %v1854_v26, %v932_v37 }
 0x35e   : > { %v964_v22 = vmul.f32 0.044715, %v938_v36  ;;  %v956_v2 = vmul.f32 0.5, %v938_v36 }
 0x35f   : > { %v963_v38 = vmul.f32 0.044715, %v933_v33  ;;  %v2093_v39 = vpop.f32.mrb[6].mxu1  ;;  %v955_v25 = vmul.f32 0.5, %v933_v33 }
 0x360   : > { %v972_v43 = vmul.f32 %v964_v22, %v938_v36  ;;  %v948_v44 = vadd.f32 %v2093_v39, %v1854_v26  ;;  %v942_v45 = vpop.f32.mrb[7].mxu1 }
 0x361   : > { %v971_v20 = vmul.f32 %v963_v38, %v933_v33  ;;  %v943_v0 = vadd.f32 %v1854_v26, %v942_v45 }
 0x362   : > { %v980_v13 = vmul.f32 %v972_v43, %v938_v36  ;;  %v966_v47 = vmul.f32 0.044715, %v948_v44  ;;  %v958_v37 = vmul.f32 0.5, %v948_v44  ;;  %v961_v43 = vmul.f32 0.044715, %v3276_v24 }
 0x363   : > { %v979_v49 = vmul.f32 %v971_v20, %v933_v33  ;;  %v965_v51 = vmul.f32 0.044715, %v943_v0  ;;  %v957_v32 = vmul.f32 0.5, %v943_v0 }
 0x364   : > { %v988_v8 = vadd.f32 %v980_v13, %v938_v36  ;;  %v974_v35 = vmul.f32 %v966_v47, %v948_v44  ;;  %v967_v36 = vmul.f32 %v959_v9, %v3257_v60  ;;  %v976_v47 = vmul.f32 %v968_v6, %v3255_v46 }
 0x365   : > { %v987_v52 = vadd.f32 %v979_v49, %v933_v33  ;;  %v973_v18 = vmul.f32 %v965_v51, %v943_v0  ;;  %v962_v33 = vmul.f32 0.044715, %v3273_v7 }
 0x366   : > { %v996_v53 = vmul.f32 0.7978846, %v988_v8  ;;  %v982_v12 = vmul.f32 %v974_v35, %v948_v44  ;;  %v975_v35 = vmul.f32 %v967_v36, %v3257_v60 }
 0x367   : > { %v981_v54 = vmul.f32 %v973_v18, %v943_v0  ;;  %v995_v55 = vmul.f32 0.7978846, %v987_v52 }
 0x368   : > { %2466 = vtanh.f32 %v996_v53  ;;  %v990_v57 = vadd.f32 %v982_v12, %v948_v44  ;;  %v970_v12 = vmul.f32 %v962_v33, %v3273_v7 }
 0x369   : > { %v989_v34 = vadd.f32 %v981_v54, %v943_v0  ;;  %2468 = vtanh.f32 %v995_v55 }
 0x36a   : > { %v998_v50 = vmul.f32 0.7978846, %v990_v57 }
 0x36b   : > { %v997_v59 = vmul.f32 0.7978846, %v989_v34  ;;  %v969_v34 = vmul.f32 %v961_v43, %v3276_v24 }
 0x36c   : > { %2470 = vtanh.f32 %v998_v50 }
 0x36d   : > { %2472 = vtanh.f32 %v997_v59 }
 0x372   : > { %v2467_v62 = vpop.eup %2466 }
 0x373   : > { %v2469_v58 = vpop.eup %2468  ;;  %v1012_v63 = vadd.f32 1.0, %v2467_v62  ;;  %v2156_v11 = vpop.f32.mrb[8].mxu1 }
 0x374   : > { %v3266_v56 = vadd.f32 %v2156_v11, %v3262_v61  ;;  %v1339_v10 = vpop.f32.mrb[9].mxu1  ;;  %v1011_v3 = vadd.f32 1.0, %v2469_v58 }
 0x375   : > { %v3270_v15 = vadd.f32 %v3262_v61, %v1339_v10  ;;  %v1020_v40 = vmul.f32 %v1012_v63, %v956_v2  ;;  %v983_v2 = vadd.f32 %v975_v35, %v3257_v60 }
 0x376   : > { %v2471_v42 = vpop.eup %2470  ;;  %v1387_v17 = vmul.f32 0.044715, %v3266_v56  ;;  %v1019_v21 = vmul.f32 %v1011_v3, %v955_v25 }
 0x377   : > { %v2473_v23 = vpop.eup %2472  ;;  %v1386_v27 = vmul.f32 0.044715, %v3270_v15  ;;  %v2159_v16 = vpop.f32.mrb[10].mxu1  ;;  %v1014_v28 = vadd.f32 1.0, %v2471_v42 }
 0x378   : > { %v1395_v29 = vmul.f32 %v1387_v17, %v3266_v56  ;;  %v3281_v30 = vadd.f32 %v2159_v16, %v3262_v61  ;;  %v1349_v31 = vpop.f32.mrb[11].mxu1  ;;  %2216 = vmatprep.mubr.msk.f32.mxu1 %vm1055_vm0, %v1019_v21  ;;  %v1013_v48 = vadd.f32 1.0, %v2473_v23  ;;  %v977_v21 = vmul.f32 %v969_v34, %v3276_v24 }
 0x379   : > { %v1394_v4 = vmul.f32 %v1386_v27, %v3270_v15  ;;  %v3287_v26 = vadd.f32 %v3262_v61, %v1349_v31  ;;  %2217 = vmatmul.mubr.msk.f32.vlgmr.msra.gmra.mrb[16].mxu1 %vm1055_vm0, %v1020_v40  ;;  %v1022_v13 = vmul.f32 %v1014_v28, %v958_v37  ;;  %v984_v31 = vadd.f32 %v976_v47, %v3255_v46 }
 0x37a   : > { %v1403_v22 = vmul.f32 %v1395_v29, %v3266_v56  ;;  %v1389_v38 = vmul.f32 0.044715, %v3281_v30  ;;  %v1021_v39 = vmul.f32 %v1013_v48, %v957_v32  ;;  %v978_v32 = vmul.f32 %v970_v12, %v3273_v7 }
 0x37b   : > { %v1402_v45 = vmul.f32 %v1394_v4, %v3270_v15  ;;  %v1388_v20 = vmul.f32 0.044715, %v3287_v26  ;;  %v2162_v0 = vpop.f32.mrb[12].mxu1  ;;  %v985_v4 = vadd.f32 %v977_v21, %v3276_v24 }
 0x37c   : > { %v1411_v49 = vadd.f32 %v1403_v22, %v3266_v56  ;;  %v1397_v44 = vmul.f32 %v1389_v38, %v3281_v30  ;;  %v3300_v51 = vadd.f32 %v2162_v0, %v3262_v61  ;;  %v1359_v8 = vpop.f32.mrb[13].mxu1  ;;  %2219 = vmatprep.mubr.msk.f32.mxu1 %vm1055_vm0, %v1021_v39  ;;  %v991_v22 = vmul.f32 0.7978846, %v983_v2 }
 0x37d   : > { %v1410_v52 = vadd.f32 %v1402_v45, %v3270_v15  ;;  %v1396_v18 = vmul.f32 %v1388_v20, %v3287_v26  ;;  %v3307_v53 = vadd.f32 %v3262_v61, %v1359_v8  ;;  %2220 = vmatmul.mubr.msk.f32.gmra.mrb[18].mxu1 %vm1055_vm0, %v1022_v13  ;;  %v992_v45 = vmul.f32 0.7978846, %v984_v31 }
 0x37e   : > { %v1419_v54 = vmul.f32 0.7978846, %v1411_v49  ;;  %v1405_v55 = vmul.f32 %v1397_v44, %v3281_v30  ;;  %v1391_v57 = vmul.f32 0.044715, %v3300_v51  ;;  %v986_v20 = vadd.f32 %v978_v32, %v3273_v7 }
 0x37f   : > { %v1404_v50 = vmul.f32 %v1396_v18, %v3287_v26  ;;  %v1390_v59 = vmul.f32 0.044715, %v3307_v53  ;;  %v2165_v62 = vpop.f32.mrb[14].mxu1  ;;  %v1418_v41 = vmul.f32 0.7978846, %v1410_v52  ;;  %v1378_v8 = vmul.f32 0.5, %v3270_v15 }
 0x380   : > { %2474 = vtanh.f32 %v1419_v54  ;;  %v1413_v58 = vadd.f32 %v1405_v55, %v3281_v30  ;;  %v1399_v63 = vmul.f32 %v1391_v57, %v3300_v51  ;;  %v3319_v11 = vadd.f32 %v2165_v62, %v3262_v61  ;;  %v1369_v10 = vpop.f32.mrb[15].mxu1 }
 0x381   : > { %v1412_v25 = vadd.f32 %v1404_v50, %v3287_v26  ;;  %v1398_v3 = vmul.f32 %v1390_v59, %v3307_v53  ;;  %v3324_v9 = vadd.f32 %v3262_v61, %v1369_v10  ;;  %2476 = vtanh.f32 %v1418_v41 }
 0x382   : > { %v1407_v42 = vmul.f32 %v1399_v63, %v3300_v51  ;;  %v1393_v6 = vmul.f32 0.044715, %v3319_v11  ;;  %v1421_v17 = vmul.f32 0.7978846, %v1413_v58  ;;  %v993_v44 = vmul.f32 0.7978846, %v985_v4 }
 0x383   : > { %v1406_v23 = vmul.f32 %v1398_v3, %v3307_v53  ;;  %v1392_v40 = vmul.f32 0.044715, %v3324_v9  ;;  %v1420_v27 = vmul.f32 0.7978846, %v1412_v25  ;;  %v1379_v52 = vmul.f32 0.5, %v3266_v56 }
 0x384   : > { %v1415_v16 = vadd.f32 %v1407_v42, %v3300_v51  ;;  %v1401_v61 = vmul.f32 %v1393_v6, %v3319_v11  ;;  %2478 = vtanh.f32 %v1421_v17  ;;  %v994_v54 = vmul.f32 0.7978846, %v986_v20 }
 0x385   : > { %v1414_v28 = vadd.f32 %v1406_v23, %v3307_v53  ;;  %v1400_v29 = vmul.f32 %v1392_v40, %v3324_v9  ;;  %2480 = vtanh.f32 %v1420_v27  ;;  %v1380_v50 = vmul.f32 0.5, %v3287_v26 }
 0x386   : > { %v1409_v48 = vmul.f32 %v1401_v61, %v3319_v11  ;;  %v1423_v36 = vmul.f32 0.7978846, %v1415_v16  ;;  %v1381_v15 = vmul.f32 0.5, %v3281_v30  ;;  %v1382_v10 = vmul.f32 0.5, %v3307_v53 }
 0x387   : > { %v1408_v37 = vmul.f32 %v1400_v29, %v3324_v9  ;;  %v1422_v33 = vmul.f32 0.7978846, %v1414_v28  ;;  %v1383_v30 = vmul.f32 0.5, %v3300_v51  ;;  %v1384_v53 = vmul.f32 0.5, %v3324_v9 }
 0x388   : > { %v1417_v38 = vadd.f32 %v1409_v48, %v3319_v11  ;;  %2482 = vtanh.f32 %v1423_v36  ;;  %v1385_v51 = vmul.f32 0.5, %v3319_v11  ;;  %v951_v27 = vmul.f32 0.5, %v3257_v60 }
 0x389   : > { %v1416_v39 = vadd.f32 %v1408_v37, %v3324_v9  ;;  %2484 = vtanh.f32 %v1422_v33  ;;  %v952_v31 = vmul.f32 0.5, %v3255_v46  ;;  %v954_v48 = vmul.f32 0.5, %v3273_v7 }
 0x38a   : > { %v2475_v43 = vpop.eup %2474  ;;  %v1425_v0 = vmul.f32 0.7978846, %v1417_v38  ;;  %2486 = vtanh.f32 %v991_v22 }
 0x38b   : > { %v2477_v13 = vpop.eup %2476  ;;  %v1435_v47 = vadd.f32 1.0, %v2475_v43  ;;  %v1424_v49 = vmul.f32 0.7978846, %v1416_v39 }
 0x38c   : > { %v1434_v35 = vadd.f32 1.0, %v2477_v13  ;;  %2488 = vtanh.f32 %v1425_v0 }
 0x38d   : > { %2490 = vtanh.f32 %v1424_v49  ;;  %v1443_v57 = vmul.f32 %v1435_v47, %v1379_v52 }
 0x38e   : > { %v2479_v18 = vpop.eup %2478  ;;  %2492 = vtanh.f32 %v992_v45  ;;  %v1442_v12 = vmul.f32 %v1434_v35, %v1378_v8 }
 0x38f   : > { %v2481_v55 = vpop.eup %2480  ;;  %v1437_v34 = vadd.f32 1.0, %v2479_v18  ;;  %2494 = vtanh.f32 %v993_v44 }
 0x390   : > { %2182 = vmatprep.mubr.msk.f32.mxu0 %vm1055_vm0, %v1442_v12  ;;  %v1436_v59 = vadd.f32 1.0, %v2481_v55  ;;  %2496 = vtanh.f32 %v994_v54 }
 0x391   : > { %2183 = vmatmul.mubr.msk.f32.vlgmr.msra.gmra.mrb[16].mxu0 %vm1055_vm0, %v1443_v57  ;;  %v1445_v58 = vmul.f32 %v1437_v34, %v1381_v15 }
 0x392   : > { %v2483_v62 = vpop.eup %2482  ;;  %2353 = vmatpush3.bf16.msra.mxu0 %v3193_v19  ;;  %v1444_v56 = vmul.f32 %v1436_v59, %v1380_v50 }
 0x393   : > { %v2485_v41 = vpop.eup %2484  ;;  %2355 = vmatprep.subr.bf16.mxu0 %v3203_v1  ;;  %v1439_v63 = vadd.f32 1.0, %v2483_v62 }
 0x394   : > { %2185 = vmatprep.mubr.msk.f32.mxu0 %vm1055_vm0, %v1444_v56  ;;  %v1438_v26 = vadd.f32 1.0, %v2485_v41  ;;  %v2487_v25 = vpop.eup %2486 }
 0x395   : > { %2186 = vmatmul.mubr.msk.f32.gmra.mrb[18].mxu0 %vm1055_vm0, %v1445_v58  ;;  %v1447_v42 = vmul.f32 %v1439_v63, %v1383_v30  ;;  %v1007_v23 = vadd.f32 1.0, %v2487_v25 }
 0x396   : > { %v2489_v3 = vpop.eup %2488  ;;  %2357 = vmatpush3.bf16.msra.mxu0 %v3203_v1  ;;  %v1446_v19 = vmul.f32 %v1438_v26, %v1382_v10 }
 0x397   : > { %v2491_v2 = vpop.eup %2490  ;;  %2359 = vmatprep.subr.bf16.mxu0 %v3213_v14  ;;  %v1441_v6 = vadd.f32 1.0, %v2489_v3  ;;  %v1015_v9 = vmul.f32 %v1007_v23, %v951_v27 }
 0x398   : > { %v2493_v17 = vpop.eup %2492  ;;  %2188 = vmatprep.mubr.msk.f32.mxu0 %vm1055_vm0, %v1446_v19  ;;  %v1440_v21 = vadd.f32 1.0, %v2491_v2 }
 0x399   : > { %v2495_v40 = vpop.eup %2494  ;;  %2189 = vmatmul.mubr.msk.f32.gmra.mrb[20].mxu0 %vm1055_vm0, %v1447_v42  ;;  %v1008_v16 = vadd.f32 1.0, %v2493_v17  ;;  %v1449_v61 = vmul.f32 %v1441_v6, %v1385_v51 }
 0x39a   : > { %2361 = vmatpush3.bf16.msra.mxu0 %v3213_v14  ;;  %v1448_v1 = vmul.f32 %v1440_v21, %v1384_v53  ;;  %v2497_v28 = vpop.eup %2496  ;;  %v1009_v29 = vadd.f32 1.0, %v2495_v40  ;;  %v953_v14 = vmul.f32 0.5, %v3276_v24  ;;  %v1880_v24 = vld [vmem:[%s3435_s21] ss:$0 sm:$0xff] }
 0x39b   : > { %2363 = vmatprep.subr.bf16.mxu0 %v3223_v5  ;;  %v1016_v60 = vmul.f32 %v1008_v16, %v952_v31  ;;  %v1010_v11 = vadd.f32 1.0, %v2497_v28 }
 0x39c   : > { %2191 = vmatprep.mubr.msk.f32.mxu0 %vm1055_vm0, %v1448_v1  ;;  %v1017_v32 = vmul.f32 %v1009_v29, %v953_v14 }
 0x39d   : > { %2192 = vmatmul.mubr.msk.f32.gmra.mrb[22].mxu0 %vm1055_vm0, %v1449_v61  ;;  %v1018_v36 = vmul.f32 %v1010_v11, %v954_v48 }
 0x39e   : > { %2365 = vmatpush3.bf16.msra.mxu0 %v3223_v5  ;;  %2210 = vmatprep.mubr.msk.f32.mxu0 %vm1055_vm0, %v1015_v9 }
 0x3a1   : > { %2211 = vmatmul.mubr.msk.f32.vlgmr.msra.gmra.mrb[16].mxu0 %vm1055_vm0, %v1016_v60 }
 0x3a2   : > { %2213 = vmatprep.mubr.msk.f32.mxu0 %vm1055_vm0, %v1017_v32 }
 0x3a5   : > { %2214 = vmatmul.mubr.msk.f32.gmra.mrb[18].mxu0 %vm1055_vm0, %v1018_v36 }
 0x44c   : > { %v2218_v46 = vpop.f32.mrb[16].mxu1 }
 0x44d   : > { %v1705_v4 = vpop.f32.mrb[17].mxu1 }
 0x450   : > { %v2221_v37 = vpop.f32.mrb[18].mxu1 }
 0x451   : > { %v1715_v5 = vpop.f32.mrb[19].mxu1 }
 0x46c   : > { %v2190_v33 = vpop.f32.mrb[20].mxu0 }
 0x46d   : > { %v1711_v22 = vadd.f32 %v2218_v46, %v2190_v33  ;;  %v1576_v38 = vpop.f32.mrb[21].mxu0 }
 0x46e   : > { %v1706_v7 = vadd.f32 %v1705_v4, %v1576_v38 }
 0x46f   : > { %v1736_v39 = vadd.f32 %v1880_v24, %v1711_v22 }
 0x470   : > { %v1735_v43 = vadd.f32 %v1880_v24, %v1706_v7  ;;  %v2193_v45 = vpop.f32.mrb[22].mxu0 }
 0x471   : > { %1745 = vst.msk [vmem:[%s495_s19 + $0x28] sm:$0xff] %vm1739_vm1, %v1736_v39  ;;  %v1721_v20 = vadd.f32 %v2221_v37, %v2193_v45  ;;  %v1586_v0 = vpop.f32.mrb[23].mxu0 }
 0x472   : > { %1744 = vst.msk [vmem:[%s495_s19 + $0x20] sm:$0xff] %vm1739_vm1, %v1735_v43  ;;  %v1716_v13 = vadd.f32 %v1715_v5, %v1586_v0 }
 0x473   : > { %v1738_v47 = vadd.f32 %v1880_v24, %v1721_v20 }
 0x474   : > { %v1737_v49 = vadd.f32 %v1880_v24, %v1716_v13  ;;  %v2212_v44 = vpop.f32.mrb[16].mxu0 }
 0x475   : > { %1747 = vst.msk [vmem:[%s495_s19 + $0x38] sm:$0xff] %vm1739_vm1, %v1738_v47  ;;  %v1732_v8 = vadd.f32 %v2212_v44, %v1880_v24  ;;  %v1685_v35 = vpop.f32.mrb[17].mxu0 }
 0x476   : > { %1746 = vst.msk [vmem:[%s495_s19 + $0x30] sm:$0xff] %vm1739_vm1, %v1737_v49  ;;  %v1731_v52 = vadd.f32 %v1880_v24, %v1685_v35 }
 0x477   : > { %1741 = vst.msk [vmem:[%s495_s19 + $0x8] sm:$0xff] %vm1739_vm1, %v1732_v8 }
 0x478   : > { %1740 = vst.msk [vmem:[%s495_s19] sm:$0xff] %vm1739_vm1, %v1731_v52  ;;  %v2215_v18 = vpop.f32.mrb[18].mxu0 }
 0x479   : > { %v1734_v12 = vadd.f32 %v2215_v18, %v1880_v24  ;;  %v1695_v54 = vpop.f32.mrb[19].mxu0 }
 0x47a   : > { %v1733_v55 = vadd.f32 %v1880_v24, %v1695_v54 }
 0x47b   : > { %1743 = vst.msk [vmem:[%s495_s19 + $0x18] sm:$0xff] %vm1739_vm1, %v1734_v12 }
 0x47c   : > { %1742 = vst.msk [vmem:[%s495_s19 + $0x10] sm:$0xff] %vm1739_vm1, %v1733_v55 }
 0x47d PF: > { %s3437_s28 = sld [smem:[#allocation8_spill]]  ;;  %s3438_s25 = smov %s2586_s26 }
 0x47e   : > { %s3439_s26 = smov %s2590_s27  ;;  %s3440_s27 = smov %s2743_s12 }
 0x483   : > { %p24_p1 = scmp.ge.s32.totalorder %s3437_s28, 4  }
 0x485   :  { %26 = sbr.rel (!%p24_p1) target bundleno = 8 (0x8), region = 119 }
 0x48c   :  { %1769 = vsyncpa [#allocation3], 1 }
 0x48d   :  { %1771 = vsyncpa [#allocation3 + $0x1], 1 }
 0x48e   :  { %1772 = vsyncpa [#allocation5], 1 }

</bundles_post_ra>
